<compile_context>
chip_gen: v7x
topology: tpu7x:2x2x1
jax: 0.10.0
libtpu: 0.0.40
codegen_flags: <defaults>
</compile_context>

<pallas_src>
import functools

import jax
import jax.numpy as jnp
from jax.experimental import pallas as pl
from jax.experimental.pallas import tpu as pltpu


def _round_up(x, m):
    return ((x + m - 1) // m) * m


# ---------------------------------------------------------------------------
# Batched matmul + bias + activation kernel (used for every conv / linear layer)
# ---------------------------------------------------------------------------
def _bmm_bias_act_kernel(x_ref, w_ref, b_ref, o_ref, acc_ref, *, act):
    """One (g, i, j, k) grid step of  act(x[g] @ w[g] + b[g])."""
    @pl.when(pl.program_id(3) == 0)
    def _():
        acc_ref[...] = jnp.zeros_like(acc_ref)

    acc_ref[...] += jnp.dot(x_ref[...], w_ref[...],
                            preferred_element_type=jnp.float32)

    @pl.when(pl.program_id(3) == pl.num_programs(3) - 1)
    def _():
        y = acc_ref[...] + b_ref[...]          # f32 epilogue on the VPU
        if act == "relu":
            y = jnp.maximum(y, 0.0)
        o_ref[...] = y.astype(o_ref.dtype)


def batched_matmul_bias_act(x, w, b, act="none", *, tm=256, tn=256, tk=512):
    """act(x @ w + b) per group.  x:(G,M,K)  w:(G,K,N)  b:(G,N)  ->  (G,M,N) f32."""
    G, M, K = x.shape
    _, _, N = w.shape

    # Tile sizes: cap at (tm, tn, tk), keep (8, 128) alignment, full dim if smaller.
    tm = min(tm, _round_up(M, 8))
    tn = min(tn, _round_up(N, 128))
    tk = min(tk, _round_up(K, 128))
    Mp, Kp, Np = _round_up(M, tm), _round_up(K, tk), _round_up(N, tn)

    # Zero-pad so tiles divide exactly (zero K-padding keeps the contraction exact),
    # cast activations/weights to bf16 for the MXU, keep bias/accum/output in f32.
    xp = jnp.pad(x.astype(jnp.bfloat16), ((0, 0), (0, Mp - M), (0, Kp - K)))
    wp = jnp.pad(w.astype(jnp.bfloat16), ((0, 0), (0, Kp - K), (0, Np - N)))
    bp = jnp.pad(b.astype(jnp.float32).reshape(G, 1, N),
                 ((0, 0), (0, 0), (0, Np - N)))

    grid = (G, Mp // tm, Np // tn, Kp // tk)
    flops = 2 * G * Mp * Np * Kp
    bytes_accessed = xp.size * 2 + wp.size * 2 + bp.size * 4 + G * Mp * Np * 4

    out = pl.pallas_call(
        functools.partial(_bmm_bias_act_kernel, act=act),
        out_shape=jax.ShapeDtypeStruct((G, Mp, Np), jnp.float32),
        grid_spec=pltpu.PrefetchScalarGridSpec(
            num_scalar_prefetch=0,
            grid=grid,
            in_specs=[
                pl.BlockSpec((pl.Squeezed(), tm, tk), lambda g, i, j, k: (g, i, k)),
                pl.BlockSpec((pl.Squeezed(), tk, tn), lambda g, i, j, k: (g, k, j)),
                pl.BlockSpec((pl.Squeezed(), 1, tn), lambda g, i, j, k: (g, 0, j)),
            ],
            out_specs=pl.BlockSpec((pl.Squeezed(), tm, tn),
                                   lambda g, i, j, k: (g, i, j)),
            scratch_shapes=[pltpu.VMEM((tm, tn), jnp.float32)],
        ),
        compiler_params=pltpu.CompilerParams(
            # view / M / N axes shard across TensorCores (2 TCs on v7x); K is the
            # sequential reduction axis (accumulator lives in VMEM scratch).
            dimension_semantics=("parallel", "parallel", "parallel", "arbitrary"),
            # Sized for v7x (64 MiB physical VMEM) with headroom; tiles here use ~2 MiB.
            vmem_limit_bytes=48 * 1024 * 1024,
        ),
        cost_estimate=pl.CostEstimate(flops=flops, transcendentals=0,
                                      bytes_accessed=bytes_accessed),
    )(xp, wp, bp)
    return out[:, :M, :N]


# ---------------------------------------------------------------------------
# Attention module kernel (gated attention, softmax over the batch axis per view)
# ---------------------------------------------------------------------------
def _attention_kernel(x_ref, vt_ref, ut_ref, w_ref, o_ref, *, n_views, batch):
    """x:(n_views*B, L) view-major rows; Vt/Ut:(L,H); w:(1,H)  ->  out:(B, L)."""
    xb = x_ref[...].astype(jnp.float32)                                 # (4B, L)
    # Both gate matmuls are single batched MXU calls in NN form (no transpose).
    x1 = jnp.tanh(jnp.dot(xb, vt_ref[...], preferred_element_type=jnp.float32))
    x2 = jax.nn.sigmoid(jnp.dot(xb, ut_ref[...], preferred_element_type=jnp.float32))
    g = x1 * x2                                                         # (4B, H)
    # w-projection as VPU multiply + lane reduction (avoids an N=1 MXU product).
    s = jnp.sum(g * w_ref[...], axis=1, keepdims=True)                  # (4B, 1)

    acc = jnp.zeros(o_ref.shape, jnp.float32)                           # (B, L)
    for v in range(n_views):                                            # 4 views, unrolled
        sv = s[v * batch:(v + 1) * batch, :]                            # (B, 1)
        sv = sv - jnp.max(sv, axis=0, keepdims=True)
        ev = jnp.exp(sv)
        weight = ev / jnp.sum(ev, axis=0, keepdims=True)                # softmax over batch
        acc = acc + weight * xb[v * batch:(v + 1) * batch, :]           # (B,1)*(B,L)
    o_ref[...] = acc.astype(o_ref.dtype)


def attention_module(x_bm, U, V, w, *, n_views, batch):
    _, L = x_bm.shape
    H = U.shape[0]
    return pl.pallas_call(
        functools.partial(_attention_kernel, n_views=n_views, batch=batch),
        out_shape=jax.ShapeDtypeStruct((batch, L), jnp.float32),
        in_specs=[pl.BlockSpec(memory_space=pltpu.MemorySpace.VMEM)] * 4,
        out_specs=pl.BlockSpec(memory_space=pltpu.MemorySpace.VMEM),
    )(x_bm.astype(jnp.float32),
      V.T.astype(jnp.float32),
      U.T.astype(jnp.float32),
      w.reshape(1, H).astype(jnp.float32))


# ---------------------------------------------------------------------------
# Conv / pooling glue (NHWC, views batched on the leading axis)
# ---------------------------------------------------------------------------
def _im2col_nhwc(h, k):
    """h: (G, B, H, W, C) -> (G, B*H*W, C*k*k) with 'same' padding, K = (c, ky, kx)."""
    G, B, H, W, C = h.shape
    p = k // 2
    hp = jnp.pad(h, ((0, 0), (0, 0), (p, p), (p, p), (0, 0)))
    cols = []
    for ky in range(k):
        for kx in range(k):
            cols.append(jax.lax.slice(hp, (0, 0, ky, kx, 0), (G, B, ky + H, kx + W, C)))
    patches = jnp.stack(cols, axis=-1)                      # (G, B, H, W, C, k*k)
    return patches.reshape(G, B * H * W, C * k * k)


def _maxpool2_nhwc(h):
    G, B, H, W, C = h.shape
    return h.reshape(G, B, H // 2, 2, W // 2, 2, C).max(axis=(3, 5))


# ---------------------------------------------------------------------------
# Parameters (deterministic synthetic init; weights stored in matmul layout)
# ---------------------------------------------------------------------------
def _xavier(key, shape, fan_in, fan_out):
    bound = (6.0 / (fan_in + fan_out)) ** 0.5
    return jax.random.uniform(key, shape, jnp.float32, -bound, bound)


def init_params(key, *, arch, latent, hidden, n_views, in_hw):
    keys = iter(jax.random.split(key, 32))
    convs = []
    cin, hw = 1, in_hw
    for (k, cout) in arch:
        kk = cin * k * k
        wc = _xavier(next(keys), (n_views, kk, cout), kk, cout)   # per-view conv weights
        bc = jnp.zeros((n_views, cout), jnp.float32)
        convs.append((k, wc, bc))
        cin, hw = cout, hw // 2
    feat = cin * hw * hw
    return dict(
        convs=convs,
        lin_w=_xavier(next(keys), (n_views, feat, latent), feat, latent),
        lin_b=jnp.zeros((n_views, latent), jnp.float32),
        att_U=_xavier(next(keys), (hidden, latent), latent, hidden),
        att_V=_xavier(next(keys), (hidden, latent), latent, hidden),
        att_w=_xavier(next(keys), (hidden, 1), 1, hidden),
    )


# ---------------------------------------------------------------------------
# Full forward pass: 4 CNN heads (fused across views) + attention over views
# ---------------------------------------------------------------------------
def multi_views_attention_forward(params, x):
    """x: (B, 4, H, W) float32  ->  (B, latent) float32."""
    B = x.shape[0]
    n_views = x.shape[1]
    h = x.transpose(1, 0, 2, 3)[..., None]                  # (4, B, H, W, 1)  NHWC

    for (k, wc, bc) in params["convs"]:
        G, Bb, Hc, Wc, _ = h.shape
        patches = _im2col_nhwc(h, k)                        # (4, B*Hc*Wc, Cin*k*k)
        y = batched_matmul_bias_act(patches, wc, bc, act="relu")   # Conv + ReLU (fused)
        h = y.reshape(G, Bb, Hc, Wc, wc.shape[-1])          # stay NHWC (no transpose)
        h = _maxpool2_nhwc(h)

    # Flatten in (C, H, W) order to mirror torch.nn.Flatten on NCHW activations.
    G, Bb, Hf, Wf, C = h.shape
    h = h.transpose(0, 1, 4, 2, 3).reshape(G, Bb, C * Hf * Wf)

    multi = batched_matmul_bias_act(h, params["lin_w"], params["lin_b"],
                                    act="relu")             # (4, B, latent)
    x_bm = multi.reshape(G * Bb, -1)                        # (4B, latent), view-major rows
    return attention_module(x_bm, params["att_U"], params["att_V"], params["att_w"],
                            n_views=n_views, batch=B)


if __name__ == "__main__":
    key = jax.random.PRNGKey(0)
    kx, kp = jax.random.split(key)

    # Small, module-consistent shapes.
    B, VIEWS, HW = 2, 4, 16
    ARCH = ((5, 8), (5, 8))          # (kernel, channels) per assumed conv block
    LATENT, HIDDEN = 32, 16

    x = jax.random.normal(kx, (B, VIEWS, HW, HW), jnp.float32)
    params = init_params(kp, arch=ARCH, latent=LATENT, hidden=HIDDEN,
                         n_views=VIEWS, in_hw=HW)

    fwd = jax.jit(functools.partial(multi_views_attention_forward, params))
    out = fwd(x)
    jax.block_until_ready(out)
    assert out.shape == (B, LATENT)
    assert bool(jnp.all(jnp.isfinite(out)))
    print("KERNEL_OK")
</pallas_src>

<mosaic_0001>
module attributes {stable_mosaic.version = 11 : i64} {
  func.func @_bmm_bias_act_kernel(%arg0: i32, %arg1: i32, %arg2: i32, %arg3: i32, %arg4: memref<1x256x128xbf16, #tpu.memory_space<vmem>>, %arg5: memref<1x128x128xbf16, #tpu.memory_space<vmem>>, %arg6: memref<1x1x128xf32, #tpu.memory_space<vmem>>, %arg7: memref<1x256x128xf32, #tpu.memory_space<vmem>>, %arg8: memref<256x128xf32, #tpu.memory_space<vmem>>) attributes {dimension_semantics = [#tpu.dimension_semantics<parallel>, #tpu.dimension_semantics<parallel>, #tpu.dimension_semantics<parallel>, #tpu.dimension_semantics<arbitrary>], iteration_bounds = array<i64: 4, 2, 1, 1>, scalar_prefetch = 0 : i64, scratch_operands = 1 : i64, tpu.core_type = #tpu.core_type<tc>, window_params = [{transform_indices = @transform_0, window_bounds = array<i64: 1, 256, 128>}, {transform_indices = @transform_1, window_bounds = array<i64: 1, 128, 128>}, {transform_indices = @transform_2, window_bounds = array<i64: 1, 1, 128>}, {transform_indices = @transform_3, window_bounds = array<i64: 1, 256, 128>}]} {
    %c0_i32 = arith.constant 0 : i32
    %0 = arith.cmpi eq, %arg3, %c0_i32 : i32
    %1 = arith.extui %0 : i1 to i32
    %c0_i32_0 = arith.constant 0 : i32
    %2 = arith.cmpi ne, %1, %c0_i32_0 : i32
    scf.if %2 {
      %cst_12 = arith.constant 0.000000e+00 : f32
      %14 = vector.broadcast %cst_12 : f32 to vector<256x128xf32>
      %c0_13 = arith.constant 0 : index
      %c0_14 = arith.constant 0 : index
      %15 = vector.load %arg8[%c0_13, %c0_14] : memref<256x128xf32, #tpu.memory_space<vmem>>, vector<256x128xf32>
      tpu.vector_store %arg8[%c0_13, %c0_14], %14 {strides = array<i32>} : memref<256x128xf32, #tpu.memory_space<vmem>>, vector<256x128xf32>,
    } else {
    }
    %c0 = arith.constant 0 : index
    %c0_1 = arith.constant 0 : index
    %3 = vector.load %arg8[%c0, %c0_1] : memref<256x128xf32, #tpu.memory_space<vmem>>, vector<256x128xf32>
    %c0_2 = arith.constant 0 : index
    %c0_3 = arith.constant 0 : index
    %c0_4 = arith.constant 0 : index
    %4 = vector.load %arg4[%c0_2, %c0_3, %c0_4] : memref<1x256x128xbf16, #tpu.memory_space<vmem>>, vector<1x256x128xbf16>
    %5 = vector.shape_cast %4 : vector<1x256x128xbf16> to vector<256x128xbf16>
    %c0_5 = arith.constant 0 : index
    %c0_6 = arith.constant 0 : index
    %c0_7 = arith.constant 0 : index
    %6 = vector.load %arg5[%c0_5, %c0_6, %c0_7] : memref<1x128x128xbf16, #tpu.memory_space<vmem>>, vector<1x128x128xbf16>
    %7 = vector.shape_cast %6 : vector<1x128x128xbf16> to vector<128x128xbf16>
    %cst = arith.constant dense<0.000000e+00> : vector<256x128xf32>
    %8 = tpu.matmul %5, %7, %cst {dimension_numbers = #tpu.dot_dimension_numbers<[1], [0], [0], [1], [0, 0, 1, 1], [], []>} : vector<256x128xbf16>, vector<128x128xbf16>, vector<256x128xf32> -> vector<256x128xf32>
    %9 = arith.addf %3, %8 : vector<256x128xf32>
    %c0_8 = arith.constant 0 : index
    %c0_9 = arith.constant 0 : index
    %10 = vector.load %arg8[%c0_8, %c0_9] : memref<256x128xf32, #tpu.memory_space<vmem>>, vector<256x128xf32>
    tpu.vector_store %arg8[%c0_8, %c0_9], %9 {strides = array<i32>} : memref<256x128xf32, #tpu.memory_space<vmem>>, vector<256x128xf32>,
    %c0_i32_10 = arith.constant 0 : i32
    %11 = arith.cmpi eq, %arg3, %c0_i32_10 : i32
    %12 = arith.extui %11 : i1 to i32
    %c0_i32_11 = arith.constant 0 : i32
    %13 = arith.cmpi ne, %12, %c0_i32_11 : i32
    scf.if %13 {
      %c0_12 = arith.constant 0 : index
      %c0_13 = arith.constant 0 : index
      %14 = vector.load %arg8[%c0_12, %c0_13] : memref<256x128xf32, #tpu.memory_space<vmem>>, vector<256x128xf32>
      %c0_14 = arith.constant 0 : index
      %c0_15 = arith.constant 0 : index
      %c0_16 = arith.constant 0 : index
      %15 = vector.load %arg6[%c0_14, %c0_15, %c0_16] : memref<1x1x128xf32, #tpu.memory_space<vmem>>, vector<1x1x128xf32>
      %16 = vector.shape_cast %15 : vector<1x1x128xf32> to vector<1x128xf32>
      %17 = vector.broadcast %16 : vector<1x128xf32> to vector<256x128xf32>
      %18 = arith.addf %14, %17 : vector<256x128xf32>
      %cst_17 = arith.constant 0.000000e+00 : f32
      %19 = vector.broadcast %cst_17 : f32 to vector<256x128xf32>
      %20 = arith.maximumf %18, %19 : vector<256x128xf32>
      %c0_18 = arith.constant 0 : index
      %c0_19 = arith.constant 0 : index
      %c0_20 = arith.constant 0 : index
      %21 = vector.load %arg7[%c0_18, %c0_19, %c0_20] : memref<1x256x128xf32, #tpu.memory_space<vmem>>, vector<1x256x128xf32>
      %22 = vector.shape_cast %21 : vector<1x256x128xf32> to vector<256x128xf32>
      %23 = vector.shape_cast %20 : vector<256x128xf32> to vector<1x256x128xf32>
      tpu.vector_store %arg7[%c0_18, %c0_19, %c0_20], %23 {strides = array<i32>} : memref<1x256x128xf32, #tpu.memory_space<vmem>>, vector<1x256x128xf32>,
    } else {
    }
    return
  }
  func.func @transform_0(%arg0: i32, %arg1: i32, %arg2: i32, %arg3: i32) -> (i32, i32, i32) {
    %c0_i32 = arith.constant 0 : i32
    return %arg0, %arg1, %arg3 : i32, i32, i32
  }
  func.func @transform_1(%arg0: i32, %arg1: i32, %arg2: i32, %arg3: i32) -> (i32, i32, i32) {
    %c0_i32 = arith.constant 0 : i32
    return %arg0, %arg3, %arg2 : i32, i32, i32
  }
  func.func @transform_2(%arg0: i32, %arg1: i32, %arg2: i32, %arg3: i32) -> (i32, i32, i32) {
    %c0_i32 = arith.constant 0 : i32
    %c0_i32_0 = arith.constant 0 : i32
    return %arg0, %c0_i32, %arg2 : i32, i32, i32
  }
  func.func @transform_3(%arg0: i32, %arg1: i32, %arg2: i32, %arg3: i32) -> (i32, i32, i32) {
    %c0_i32 = arith.constant 0 : i32
    return %arg0, %arg1, %arg2 : i32, i32, i32
  }
}

module attributes {stable_mosaic.version = 11 : i64} {
  func.func @_bmm_bias_act_kernel(%arg0: i32, %arg1: i32, %arg2: i32, %arg3: i32, %arg4: memref<1x128x256xbf16, #tpu.memory_space<vmem>>, %arg5: memref<1x256x128xbf16, #tpu.memory_space<vmem>>, %arg6: memref<1x1x128xf32, #tpu.memory_space<vmem>>, %arg7: memref<1x128x128xf32, #tpu.memory_space<vmem>>, %arg8: memref<128x128xf32, #tpu.memory_space<vmem>>) attributes {dimension_semantics = [#tpu.dimension_semantics<parallel>, #tpu.dimension_semantics<parallel>, #tpu.dimension_semantics<parallel>, #tpu.dimension_semantics<arbitrary>], iteration_bounds = array<i64: 4, 1, 1, 1>, scalar_prefetch = 0 : i64, scratch_operands = 1 : i64, tpu.core_type = #tpu.core_type<tc>, window_params = [{transform_indices = @transform_0, window_bounds = array<i64: 1, 128, 256>}, {transform_indices = @transform_1, window_bounds = array<i64: 1, 256, 128>}, {transform_indices = @transform_2, window_bounds = array<i64: 1, 1, 128>}, {transform_indices = @transform_3, window_bounds = array<i64: 1, 128, 128>}]} {
    %c0_i32 = arith.constant 0 : i32
    %0 = arith.cmpi eq, %arg3, %c0_i32 : i32
    %1 = arith.extui %0 : i1 to i32
    %c0_i32_0 = arith.constant 0 : i32
    %2 = arith.cmpi ne, %1, %c0_i32_0 : i32
    scf.if %2 {
      %cst_12 = arith.constant 0.000000e+00 : f32
      %14 = vector.broadcast %cst_12 : f32 to vector<128x128xf32>
      %c0_13 = arith.constant 0 : index
      %c0_14 = arith.constant 0 : index
      %15 = vector.load %arg8[%c0_13, %c0_14] : memref<128x128xf32, #tpu.memory_space<vmem>>, vector<128x128xf32>
      tpu.vector_store %arg8[%c0_13, %c0_14], %14 {strides = array<i32>} : memref<128x128xf32, #tpu.memory_space<vmem>>, vector<128x128xf32>,
    } else {
    }
    %c0 = arith.constant 0 : index
    %c0_1 = arith.constant 0 : index
    %3 = vector.load %arg8[%c0, %c0_1] : memref<128x128xf32, #tpu.memory_space<vmem>>, vector<128x128xf32>
    %c0_2 = arith.constant 0 : index
    %c0_3 = arith.constant 0 : index
    %c0_4 = arith.constant 0 : index
    %4 = vector.load %arg4[%c0_2, %c0_3, %c0_4] : memref<1x128x256xbf16, #tpu.memory_space<vmem>>, vector<1x128x256xbf16>
    %5 = vector.shape_cast %4 : vector<1x128x256xbf16> to vector<128x256xbf16>
    %c0_5 = arith.constant 0 : index
    %c0_6 = arith.constant 0 : index
    %c0_7 = arith.constant 0 : index
    %6 = vector.load %arg5[%c0_5, %c0_6, %c0_7] : memref<1x256x128xbf16, #tpu.memory_space<vmem>>, vector<1x256x128xbf16>
    %7 = vector.shape_cast %6 : vector<1x256x128xbf16> to vector<256x128xbf16>
    %cst = arith.constant dense<0.000000e+00> : vector<128x128xf32>
    %8 = tpu.matmul %5, %7, %cst {dimension_numbers = #tpu.dot_dimension_numbers<[1], [0], [0], [1], [0, 0, 1, 1], [], []>} : vector<128x256xbf16>, vector<256x128xbf16>, vector<128x128xf32> -> vector<128x128xf32>
    %9 = arith.addf %3, %8 : vector<128x128xf32>
    %c0_8 = arith.constant 0 : index
    %c0_9 = arith.constant 0 : index
    %10 = vector.load %arg8[%c0_8, %c0_9] : memref<128x128xf32, #tpu.memory_space<vmem>>, vector<128x128xf32>
    tpu.vector_store %arg8[%c0_8, %c0_9], %9 {strides = array<i32>} : memref<128x128xf32, #tpu.memory_space<vmem>>, vector<128x128xf32>,
    %c0_i32_10 = arith.constant 0 : i32
    %11 = arith.cmpi eq, %arg3, %c0_i32_10 : i32
    %12 = arith.extui %11 : i1 to i32
    %c0_i32_11 = arith.constant 0 : i32
    %13 = arith.cmpi ne, %12, %c0_i32_11 : i32
    scf.if %13 {
      %c0_12 = arith.constant 0 : index
      %c0_13 = arith.constant 0 : index
      %14 = vector.load %arg8[%c0_12, %c0_13] : memref<128x128xf32, #tpu.memory_space<vmem>>, vector<128x128xf32>
      %c0_14 = arith.constant 0 : index
      %c0_15 = arith.constant 0 : index
      %c0_16 = arith.constant 0 : index
      %15 = vector.load %arg6[%c0_14, %c0_15, %c0_16] : memref<1x1x128xf32, #tpu.memory_space<vmem>>, vector<1x1x128xf32>
      %16 = vector.shape_cast %15 : vector<1x1x128xf32> to vector<1x128xf32>
      %17 = vector.broadcast %16 : vector<1x128xf32> to vector<128x128xf32>
      %18 = arith.addf %14, %17 : vector<128x128xf32>
      %cst_17 = arith.constant 0.000000e+00 : f32
      %19 = vector.broadcast %cst_17 : f32 to vector<128x128xf32>
      %20 = arith.maximumf %18, %19 : vector<128x128xf32>
      %c0_18 = arith.constant 0 : index
      %c0_19 = arith.constant 0 : index
      %c0_20 = arith.constant 0 : index
      %21 = vector.load %arg7[%c0_18, %c0_19, %c0_20] : memref<1x128x128xf32, #tpu.memory_space<vmem>>, vector<1x128x128xf32>
      %22 = vector.shape_cast %21 : vector<1x128x128xf32> to vector<128x128xf32>
      %23 = vector.shape_cast %20 : vector<128x128xf32> to vector<1x128x128xf32>
      tpu.vector_store %arg7[%c0_18, %c0_19, %c0_20], %23 {strides = array<i32>} : memref<1x128x128xf32, #tpu.memory_space<vmem>>, vector<1x128x128xf32>,
    } else {
    }
    return
  }
  func.func @transform_0(%arg0: i32, %arg1: i32, %arg2: i32, %arg3: i32) -> (i32, i32, i32) {
    %c0_i32 = arith.constant 0 : i32
    return %arg0, %arg1, %arg3 : i32, i32, i32
  }
  func.func @transform_1(%arg0: i32, %arg1: i32, %arg2: i32, %arg3: i32) -> (i32, i32, i32) {
    %c0_i32 = arith.constant 0 : i32
    return %arg0, %arg3, %arg2 : i32, i32, i32
  }
  func.func @transform_2(%arg0: i32, %arg1: i32, %arg2: i32, %arg3: i32) -> (i32, i32, i32) {
    %c0_i32 = arith.constant 0 : i32
    %c0_i32_0 = arith.constant 0 : i32
    return %arg0, %c0_i32, %arg2 : i32, i32, i32
  }
  func.func @transform_3(%arg0: i32, %arg1: i32, %arg2: i32, %arg3: i32) -> (i32, i32, i32) {
    %c0_i32 = arith.constant 0 : i32
    return %arg0, %arg1, %arg2 : i32, i32, i32
  }
}

module attributes {stable_mosaic.version = 11 : i64} {
  func.func @_bmm_bias_act_kernel(%arg0: i32, %arg1: i32, %arg2: i32, %arg3: i32, %arg4: memref<1x8x128xbf16, #tpu.memory_space<vmem>>, %arg5: memref<1x128x128xbf16, #tpu.memory_space<vmem>>, %arg6: memref<1x1x128xf32, #tpu.memory_space<vmem>>, %arg7: memref<1x8x128xf32, #tpu.memory_space<vmem>>, %arg8: memref<8x128xf32, #tpu.memory_space<vmem>>) attributes {dimension_semantics = [#tpu.dimension_semantics<parallel>, #tpu.dimension_semantics<parallel>, #tpu.dimension_semantics<parallel>, #tpu.dimension_semantics<arbitrary>], iteration_bounds = array<i64: 4, 1, 1, 1>, scalar_prefetch = 0 : i64, scratch_operands = 1 : i64, tpu.core_type = #tpu.core_type<tc>, window_params = [{transform_indices = @transform_0, window_bounds = array<i64: 1, 8, 128>}, {transform_indices = @transform_1, window_bounds = array<i64: 1, 128, 128>}, {transform_indices = @transform_2, window_bounds = array<i64: 1, 1, 128>}, {transform_indices = @transform_3, window_bounds = array<i64: 1, 8, 128>}]} {
    %c0_i32 = arith.constant 0 : i32
    %0 = arith.cmpi eq, %arg3, %c0_i32 : i32
    %1 = arith.extui %0 : i1 to i32
    %c0_i32_0 = arith.constant 0 : i32
    %2 = arith.cmpi ne, %1, %c0_i32_0 : i32
    scf.if %2 {
      %cst_12 = arith.constant 0.000000e+00 : f32
      %14 = vector.broadcast %cst_12 : f32 to vector<8x128xf32>
      %c0_13 = arith.constant 0 : index
      %c0_14 = arith.constant 0 : index
      %15 = vector.load %arg8[%c0_13, %c0_14] : memref<8x128xf32, #tpu.memory_space<vmem>>, vector<8x128xf32>
      tpu.vector_store %arg8[%c0_13, %c0_14], %14 {strides = array<i32>} : memref<8x128xf32, #tpu.memory_space<vmem>>, vector<8x128xf32>,
    } else {
    }
    %c0 = arith.constant 0 : index
    %c0_1 = arith.constant 0 : index
    %3 = vector.load %arg8[%c0, %c0_1] : memref<8x128xf32, #tpu.memory_space<vmem>>, vector<8x128xf32>
    %c0_2 = arith.constant 0 : index
    %c0_3 = arith.constant 0 : index
    %c0_4 = arith.constant 0 : index
    %4 = vector.load %arg4[%c0_2, %c0_3, %c0_4] : memref<1x8x128xbf16, #tpu.memory_space<vmem>>, vector<1x8x128xbf16>
    %5 = vector.shape_cast %4 : vector<1x8x128xbf16> to vector<8x128xbf16>
    %c0_5 = arith.constant 0 : index
    %c0_6 = arith.constant 0 : index
    %c0_7 = arith.constant 0 : index
    %6 = vector.load %arg5[%c0_5, %c0_6, %c0_7] : memref<1x128x128xbf16, #tpu.memory_space<vmem>>, vector<1x128x128xbf16>
    %7 = vector.shape_cast %6 : vector<1x128x128xbf16> to vector<128x128xbf16>
    %cst = arith.constant dense<0.000000e+00> : vector<8x128xf32>
    %8 = tpu.matmul %5, %7, %cst {dimension_numbers = #tpu.dot_dimension_numbers<[1], [0], [0], [1], [0, 0, 1, 1], [], []>} : vector<8x128xbf16>, vector<128x128xbf16>, vector<8x128xf32> -> vector<8x128xf32>
    %9 = arith.addf %3, %8 : vector<8x128xf32>
    %c0_8 = arith.constant 0 : index
    %c0_9 = arith.constant 0 : index
    %10 = vector.load %arg8[%c0_8, %c0_9] : memref<8x128xf32, #tpu.memory_space<vmem>>, vector<8x128xf32>
    tpu.vector_store %arg8[%c0_8, %c0_9], %9 {strides = array<i32>} : memref<8x128xf32, #tpu.memory_space<vmem>>, vector<8x128xf32>,
    %c0_i32_10 = arith.constant 0 : i32
    %11 = arith.cmpi eq, %arg3, %c0_i32_10 : i32
    %12 = arith.extui %11 : i1 to i32
    %c0_i32_11 = arith.constant 0 : i32
    %13 = arith.cmpi ne, %12, %c0_i32_11 : i32
    scf.if %13 {
      %c0_12 = arith.constant 0 : index
      %c0_13 = arith.constant 0 : index
      %14 = vector.load %arg8[%c0_12, %c0_13] : memref<8x128xf32, #tpu.memory_space<vmem>>, vector<8x128xf32>
      %c0_14 = arith.constant 0 : index
      %c0_15 = arith.constant 0 : index
      %c0_16 = arith.constant 0 : index
      %15 = vector.load %arg6[%c0_14, %c0_15, %c0_16] : memref<1x1x128xf32, #tpu.memory_space<vmem>>, vector<1x1x128xf32>
      %16 = vector.shape_cast %15 : vector<1x1x128xf32> to vector<1x128xf32>
      %17 = vector.broadcast %16 : vector<1x128xf32> to vector<8x128xf32>
      %18 = arith.addf %14, %17 : vector<8x128xf32>
      %cst_17 = arith.constant 0.000000e+00 : f32
      %19 = vector.broadcast %cst_17 : f32 to vector<8x128xf32>
      %20 = arith.maximumf %18, %19 : vector<8x128xf32>
      %c0_18 = arith.constant 0 : index
      %c0_19 = arith.constant 0 : index
      %c0_20 = arith.constant 0 : index
      %21 = vector.load %arg7[%c0_18, %c0_19, %c0_20] : memref<1x8x128xf32, #tpu.memory_space<vmem>>, vector<1x8x128xf32>
      %22 = vector.shape_cast %21 : vector<1x8x128xf32> to vector<8x128xf32>
      %23 = vector.shape_cast %20 : vector<8x128xf32> to vector<1x8x128xf32>
      tpu.vector_store %arg7[%c0_18, %c0_19, %c0_20], %23 {strides = array<i32>} : memref<1x8x128xf32, #tpu.memory_space<vmem>>, vector<1x8x128xf32>,
    } else {
    }
    return
  }
  func.func @transform_0(%arg0: i32, %arg1: i32, %arg2: i32, %arg3: i32) -> (i32, i32, i32) {
    %c0_i32 = arith.constant 0 : i32
    return %arg0, %arg1, %arg3 : i32, i32, i32
  }
  func.func @transform_1(%arg0: i32, %arg1: i32, %arg2: i32, %arg3: i32) -> (i32, i32, i32) {
    %c0_i32 = arith.constant 0 : i32
    return %arg0, %arg3, %arg2 : i32, i32, i32
  }
  func.func @transform_2(%arg0: i32, %arg1: i32, %arg2: i32, %arg3: i32) -> (i32, i32, i32) {
    %c0_i32 = arith.constant 0 : i32
    %c0_i32_0 = arith.constant 0 : i32
    return %arg0, %c0_i32, %arg2 : i32, i32, i32
  }
  func.func @transform_3(%arg0: i32, %arg1: i32, %arg2: i32, %arg3: i32) -> (i32, i32, i32) {
    %c0_i32 = arith.constant 0 : i32
    return %arg0, %arg1, %arg2 : i32, i32, i32
  }
}

module attributes {stable_mosaic.version = 11 : i64} {
  func.func @_attention_kernel(%arg0: memref<8x32xf32, #tpu.memory_space<vmem>>, %arg1: memref<32x16xf32, #tpu.memory_space<vmem>>, %arg2: memref<32x16xf32, #tpu.memory_space<vmem>>, %arg3: memref<1x16xf32, #tpu.memory_space<vmem>>, %arg4: memref<2x32xf32, #tpu.memory_space<vmem>>) attributes {dimension_semantics = [], scalar_prefetch = 0 : i64, scratch_operands = 0 : i64, tpu.core_type = #tpu.core_type<tc>} {
    %c0 = arith.constant 0 : index
    %c0_0 = arith.constant 0 : index
    %0 = vector.load %arg0[%c0, %c0_0] : memref<8x32xf32, #tpu.memory_space<vmem>>, vector<8x32xf32>
    %c0_1 = arith.constant 0 : index
    %c0_2 = arith.constant 0 : index
    %1 = vector.load %arg1[%c0_1, %c0_2] : memref<32x16xf32, #tpu.memory_space<vmem>>, vector<32x16xf32>
    %cst = arith.constant dense<0.000000e+00> : vector<8x16xf32>
    %2 = tpu.matmul %0, %1, %cst {dimension_numbers = #tpu.dot_dimension_numbers<[1], [0], [0], [1], [0, 0, 1, 1], [], []>} : vector<8x32xf32>, vector<32x16xf32>, vector<8x16xf32> -> vector<8x16xf32>
    %3 = math.tanh %2 : vector<8x16xf32>
    %c0_3 = arith.constant 0 : index
    %c0_4 = arith.constant 0 : index
    %4 = vector.load %arg2[%c0_3, %c0_4] : memref<32x16xf32, #tpu.memory_space<vmem>>, vector<32x16xf32>
    %cst_5 = arith.constant dense<0.000000e+00> : vector<8x16xf32>
    %5 = tpu.matmul %0, %4, %cst_5 {dimension_numbers = #tpu.dot_dimension_numbers<[1], [0], [0], [1], [0, 0, 1, 1], [], []>} : vector<8x32xf32>, vector<32x16xf32>, vector<8x16xf32> -> vector<8x16xf32>
    %6 = arith.negf %5 : vector<8x16xf32>
    %7 = math.exp %6 : vector<8x16xf32>
    %cst_6 = arith.constant 1.000000e+00 : f32
    %8 = vector.broadcast %cst_6 : f32 to vector<8x16xf32>
    %9 = arith.addf %8, %7 : vector<8x16xf32>
    %10 = arith.divf %8, %9 : vector<8x16xf32>
    %11 = arith.mulf %3, %10 : vector<8x16xf32>
    %c0_7 = arith.constant 0 : index
    %c0_8 = arith.constant 0 : index
    %12 = vector.load %arg3[%c0_7, %c0_8] : memref<1x16xf32, #tpu.memory_space<vmem>>, vector<1x16xf32>
    %13 = vector.broadcast %12 : vector<1x16xf32> to vector<8x16xf32>
    %14 = arith.mulf %11, %13 : vector<8x16xf32>
    %cst_9 = arith.constant dense<0.000000e+00> : vector<8xf32>
    %15 = vector.multi_reduction <add>, %14, %cst_9 [1] : vector<8x16xf32> to vector<8xf32>
    %16 = vector.shape_cast %15 : vector<8xf32> to vector<8x1xf32>
    %cst_10 = arith.constant 0.000000e+00 : f32
    %17 = vector.broadcast %cst_10 : f32 to vector<2x32xf32>
    %18 = vector.extract_strided_slice %16 {offsets = [0, 0], sizes = [2, 1], strides = [1, 1]} : vector<8x1xf32> to vector<2x1xf32>
    %cst_11 = arith.constant dense<0xFF800000> : vector<1xf32>
    %19 = vector.multi_reduction <maximumf>, %18, %cst_11 [0] : vector<2x1xf32> to vector<1xf32>
    %20 = vector.shape_cast %19 : vector<1xf32> to vector<1x1xf32>
    %21 = vector.broadcast %20 : vector<1x1xf32> to vector<2x1xf32>
    %22 = arith.subf %18, %21 : vector<2x1xf32>
    %23 = math.exp %22 : vector<2x1xf32>
    %cst_12 = arith.constant dense<0.000000e+00> : vector<1xf32>
    %24 = vector.multi_reduction <add>, %23, %cst_12 [0] : vector<2x1xf32> to vector<1xf32>
    %25 = vector.shape_cast %24 : vector<1xf32> to vector<1x1xf32>
    %26 = vector.broadcast %25 : vector<1x1xf32> to vector<2x1xf32>
    %27 = arith.divf %23, %26 : vector<2x1xf32>
    %28 = vector.extract_strided_slice %0 {offsets = [0, 0], sizes = [2, 32], strides = [1, 1]} : vector<8x32xf32> to vector<2x32xf32>
    %29 = vector.broadcast %27 : vector<2x1xf32> to vector<2x32xf32>
    %30 = arith.mulf %29, %28 : vector<2x32xf32>
    %31 = arith.addf %17, %30 : vector<2x32xf32>
    %32 = vector.extract_strided_slice %16 {offsets = [2, 0], sizes = [2, 1], strides = [1, 1]} : vector<8x1xf32> to vector<2x1xf32>
    %cst_13 = arith.constant dense<0xFF800000> : vector<1xf32>
    %33 = vector.multi_reduction <maximumf>, %32, %cst_13 [0] : vector<2x1xf32> to vector<1xf32>
    %34 = vector.shape_cast %33 : vector<1xf32> to vector<1x1xf32>
    %35 = vector.broadcast %34 : vector<1x1xf32> to vector<2x1xf32>
    %36 = arith.subf %32, %35 : vector<2x1xf32>
    %37 = math.exp %36 : vector<2x1xf32>
    %cst_14 = arith.constant dense<0.000000e+00> : vector<1xf32>
    %38 = vector.multi_reduction <add>, %37, %cst_14 [0] : vector<2x1xf32> to vector<1xf32>
    %39 = vector.shape_cast %38 : vector<1xf32> to vector<1x1xf32>
    %40 = vector.broadcast %39 : vector<1x1xf32> to vector<2x1xf32>
    %41 = arith.divf %37, %40 : vector<2x1xf32>
    %42 = vector.extract_strided_slice %0 {offsets = [2, 0], sizes = [2, 32], strides = [1, 1]} : vector<8x32xf32> to vector<2x32xf32>
    %43 = vector.broadcast %41 : vector<2x1xf32> to vector<2x32xf32>
    %44 = arith.mulf %43, %42 : vector<2x32xf32>
    %45 = arith.addf %31, %44 : vector<2x32xf32>
    %46 = vector.extract_strided_slice %16 {offsets = [4, 0], sizes = [2, 1], strides = [1, 1]} : vector<8x1xf32> to vector<2x1xf32>
    %cst_15 = arith.constant dense<0xFF800000> : vector<1xf32>
    %47 = vector.multi_reduction <maximumf>, %46, %cst_15 [0] : vector<2x1xf32> to vector<1xf32>
    %48 = vector.shape_cast %47 : vector<1xf32> to vector<1x1xf32>
    %49 = vector.broadcast %48 : vector<1x1xf32> to vector<2x1xf32>
    %50 = arith.subf %46, %49 : vector<2x1xf32>
    %51 = math.exp %50 : vector<2x1xf32>
    %cst_16 = arith.constant dense<0.000000e+00> : vector<1xf32>
    %52 = vector.multi_reduction <add>, %51, %cst_16 [0] : vector<2x1xf32> to vector<1xf32>
    %53 = vector.shape_cast %52 : vector<1xf32> to vector<1x1xf32>
    %54 = vector.broadcast %53 : vector<1x1xf32> to vector<2x1xf32>
    %55 = arith.divf %51, %54 : vector<2x1xf32>
    %56 = vector.extract_strided_slice %0 {offsets = [4, 0], sizes = [2, 32], strides = [1, 1]} : vector<8x32xf32> to vector<2x32xf32>
    %57 = vector.broadcast %55 : vector<2x1xf32> to vector<2x32xf32>
    %58 = arith.mulf %57, %56 : vector<2x32xf32>
    %59 = arith.addf %45, %58 : vector<2x32xf32>
    %60 = vector.extract_strided_slice %16 {offsets = [6, 0], sizes = [2, 1], strides = [1, 1]} : vector<8x1xf32> to vector<2x1xf32>
    %cst_17 = arith.constant dense<0xFF800000> : vector<1xf32>
    %61 = vector.multi_reduction <maximumf>, %60, %cst_17 [0] : vector<2x1xf32> to vector<1xf32>
    %62 = vector.shape_cast %61 : vector<1xf32> to vector<1x1xf32>
    %63 = vector.broadcast %62 : vector<1x1xf32> to vector<2x1xf32>
    %64 = arith.subf %60, %63 : vector<2x1xf32>
    %65 = math.exp %64 : vector<2x1xf32>
    %cst_18 = arith.constant dense<0.000000e+00> : vector<1xf32>
    %66 = vector.multi_reduction <add>, %65, %cst_18 [0] : vector<2x1xf32> to vector<1xf32>
    %67 = vector.shape_cast %66 : vector<1xf32> to vector<1x1xf32>
    %68 = vector.broadcast %67 : vector<1x1xf32> to vector<2x1xf32>
    %69 = arith.divf %65, %68 : vector<2x1xf32>
    %70 = vector.extract_strided_slice %0 {offsets = [6, 0], sizes = [2, 32], strides = [1, 1]} : vector<8x32xf32> to vector<2x32xf32>
    %71 = vector.broadcast %69 : vector<2x1xf32> to vector<2x32xf32>
    %72 = arith.mulf %71, %70 : vector<2x32xf32>
    %73 = arith.addf %59, %72 : vector<2x32xf32>
    %c0_19 = arith.constant 0 : index
    %c0_20 = arith.constant 0 : index
    %74 = vector.load %arg4[%c0_19, %c0_20] : memref<2x32xf32, #tpu.memory_space<vmem>>, vector<2x32xf32>
    tpu.vector_store %arg4[%c0_19, %c0_20], %73 {strides = array<i32>} : memref<2x32xf32, #tpu.memory_space<vmem>>, vector<2x32xf32>,
    return
  }
}

</mosaic_0001>

<bundles_post_ra>
// kernel: multi_views_attention_forward.4
= control target key start
LH: loop header
LB: loop body
LE: loop exit
PB: predicated region body
PF: predicated region fallthrough
CT: control target
= control target key end

     0   :  { %s1334_s12 = smov 0   ;;  %s1336_s13 = smov 0   ;;  %s1495_s0 = inlined_call_operand.vmem [shape: bf16[4,512,128], index: 0, kind: input, shape index: {}]   ;;  %s1496_s1 = inlined_call_operand.vmem [shape: bf16[4,128,128], index: 1, kind: input, shape index: {}]   ;;  %s1497_s2 = inlined_call_operand.vmem [shape: f32[4,1,128], index: 2, kind: input, shape index: {}]   ;;  %s1498_s3 = inlined_call_operand.vmem [shape: f32[4,512,128], index: 3, kind: output, shape index: {}]  }
   0x1   :  { %s1338_s14 = smov 0   ;;  %s1340_s15 = smov 0  }
   0x2   :  { %s1342_s16 = smov 0  }
   0x3 LB: > { %s35_s17 = sadd.s32 1, %s1304_s14  ;;  %s39_s18 = sadd.s32 1, %s1308_s15  ;;  %s1312_s16 = sphi %s1342_s16, %s13_s16   ;;  %s1308_s15 = sphi %s1340_s15, %s1502_s15   ;;  %s1304_s14 = sphi %s1338_s14, %s1501_s14   ;;  %s1300_s13 = sphi %s1336_s13, %s1500_s13   ;;  %s1296_s12 = sphi %s1334_s12, %s1499_s12  }
   0x4   : > { %p37_p0 = scmp.ge.s32.totalorder %s35_s17, 2  ;;  %p1085_p1 = scmp.ge.s32.totalorder %s1312_s16, 1 }
   0x5   : > { %p214_p2 = scmp.lt.s32.totalorder %s1312_s16, 9 }
   0x6   : > { %s1504_s17 = smov (%p37_p0, %s35_s17), 0  ;;  %s1506_s18 = smov (!%p37_p0, %s39_s18), %s1308_s15 }
   0x7   : > { %p215_p3 = pnand %p1085_p1, %p214_p2  ;;  %p41_p4 = scmp.ge.s32.totalorder %s1506_s18, 4 }
   0x8   : > { %s1086_s19 = sshll.u32 (!%p215_p3), %s1296_s12, 5  ;;  %p271_p5 = scmp.lt.s32.totalorder (!%p215_p3), %s1300_s13, 3 }
   0x9   : > { %s1508_s18 = smov (%p41_p4, %s1506_s18), 0  ;;  %218 = sbr.rel (%p215_p3) target bundleno = 296 (0x128), region = 32 }
   0xa   : > { %p273_p6 = scmp.lt.s32.totalorder (!%p215_p3), %s1086_s19, 63 }
  0x10   : > { %s1510_s13 = smov (!%p271_p5, %s1300_s13), 3  ;;  %s1512_s19 = smov (!%p273_p6, %s1086_s19), 63 }
  0x11   : > { %s1087_s20 = sshll.u32 %s1510_s13, 6  ;;  %s301_s4 = scalar_lea.vmem %s1497_s2, %s1510_s13 }
  0x12   : > { %s1370_s23 = scalar_lea.vmem %s1496_s1, %s1087_s20  ;;  %s1372_s24 = sadd.s32 %s1087_s20, %s1512_s19  ;;  %v1408_v24 = vld [vmem:[%s301_s4] ss:$0 sm:$0xff] }
  0x13   : > { %v1250_v0 = vld [vmem:[%s1370_s23] sm:$0xff]   ;;  %v1251_v1 = vld [vmem:[%s1370_s23 + $0x8] sm:$0xff]   ;;  %s1088_s25 = sshll.u32 %s1372_s24, 2  ;;  %v1252_v2 = vld [vmem:[%s1370_s23 + $0x10] sm:$0xff]   ;;  %s1093_s5 = sshll.u32 %s1372_s24, 3 }
  0x14   : > { %1146 = vmatprep.subr.bf16.mxu0 %v1250_v0  ;;  %1194 = vmatprep.subr.bf16.mxu1 %v1250_v0  ;;  %s1381_s28 = scalar_lea.vmem %s1495_s0, %s1088_s25  ;;  %v1253_v3 = vld [vmem:[%s1370_s23 + $0x18] sm:$0xff]   ;;  %v1254_v6 = vld [vmem:[%s1370_s23 + $0x20] sm:$0xff]   ;;  %v1255_v7 = vld [vmem:[%s1370_s23 + $0x28] sm:$0xff]   ;;  %s1416_s8 = scalar_lea.vmem %s1498_s3, %s1093_s5 }
  0x15   : > { %1147 = vmatpush3.bf16.msra.mxu0 %v1250_v0  ;;  %1202 = vmatpush3.bf16.msra.mxu1 %v1250_v0  ;;  %v1258_v4 = vld [vmem:[%s1381_s28] sm:$0xff]   ;;  %v1256_v8 = vld [vmem:[%s1370_s23 + $0x30] sm:$0xff]   ;;  %v1257_v9 = vld [vmem:[%s1370_s23 + $0x38] sm:$0xff]  }
  0x16   : > { %1148 = vmatprep.subr.bf16.mxu0 %v1251_v1  ;;  %1195 = vmatprep.subr.bf16.mxu1 %v1251_v1  ;;  %v1259_v5 = vld [vmem:[%s1381_s28 + $0x40] sm:$0xff]   ;;  %v1260_v10 = vld [vmem:[%s1381_s28 + $0x8] sm:$0xff]   ;;  %v1262_v12 = vld [vmem:[%s1381_s28 + $0x10] sm:$0xff]  }
  0x17   : > { %1162 = vmatprep.mubr.bf16.mxu0 %v1258_v4  ;;  %1178 = vmatprep.mubr.bf16.mxu1 %v1259_v5  ;;  %v1261_v11 = vld [vmem:[%s1381_s28 + $0x48] sm:$0xff]   ;;  %v1263_v13 = vld [vmem:[%s1381_s28 + $0x50] sm:$0xff]   ;;  %v1264_v14 = vld [vmem:[%s1381_s28 + $0x18] sm:$0xff]  }
  0x18   : > { %v1265_v15 = vld [vmem:[%s1381_s28 + $0x58] sm:$0xff]   ;;  %v1266_v16 = vld [vmem:[%s1381_s28 + $0x20] sm:$0xff]   ;;  %v1268_v18 = vld [vmem:[%s1381_s28 + $0x28] sm:$0xff]  }
  0x19   : > { %1149 = vmatpush3.bf16.msra.mxu0 %v1251_v1  ;;  %1203 = vmatpush3.bf16.msra.mxu1 %v1251_v1  ;;  %v1267_v17 = vld [vmem:[%s1381_s28 + $0x60] sm:$0xff]   ;;  %v1269_v19 = vld [vmem:[%s1381_s28 + $0x68] sm:$0xff]   ;;  %v1270_v20 = vld [vmem:[%s1381_s28 + $0x30] sm:$0xff]  }
  0x1a   : > { %1150 = vmatprep.subr.bf16.mxu0 %v1252_v2  ;;  %1196 = vmatprep.subr.bf16.mxu1 %v1252_v2  ;;  %v1271_v21 = vld [vmem:[%s1381_s28 + $0x70] sm:$0xff]   ;;  %v1272_v22 = vld [vmem:[%s1381_s28 + $0x38] sm:$0xff]  }
  0x1b   : > { %v1273_v23 = vld [vmem:[%s1381_s28 + $0x78] sm:$0xff]  }
  0x1d   : > { %1151 = vmatpush3.bf16.msra.mxu0 %v1252_v2  ;;  %1204 = vmatpush3.bf16.msra.mxu1 %v1252_v2 }
  0x1e   : > { %1152 = vmatprep.subr.bf16.mxu0 %v1253_v3  ;;  %1197 = vmatprep.subr.bf16.mxu1 %v1253_v3 }
  0x21   : > { %1153 = vmatpush3.bf16.msra.mxu0 %v1253_v3  ;;  %1205 = vmatpush3.bf16.msra.mxu1 %v1253_v3 }
  0x22   : > { %1154 = vmatprep.subr.bf16.mxu0 %v1254_v6  ;;  %1198 = vmatprep.subr.bf16.mxu1 %v1254_v6 }
  0x25   : > { %1155 = vmatpush3.bf16.msra.mxu0 %v1254_v6  ;;  %1206 = vmatpush3.bf16.msra.mxu1 %v1254_v6 }
  0x26   : > { %1156 = vmatprep.subr.bf16.mxu0 %v1255_v7  ;;  %1199 = vmatprep.subr.bf16.mxu1 %v1255_v7 }
  0x29   : > { %1157 = vmatpush3.bf16.msra.mxu0 %v1255_v7  ;;  %1207 = vmatpush3.bf16.msra.mxu1 %v1255_v7 }
  0x2a   : > { %1158 = vmatprep.subr.bf16.mxu0 %v1256_v8  ;;  %1200 = vmatprep.subr.bf16.mxu1 %v1256_v8 }
  0x2d   : > { %1159 = vmatpush3.bf16.msra.mxu0 %v1256_v8  ;;  %1208 = vmatpush3.bf16.msra.mxu1 %v1256_v8 }
  0x2e   : > { %1160 = vmatprep.subr.bf16.mxu0 %v1257_v9  ;;  %1201 = vmatprep.subr.bf16.mxu1 %v1257_v9 }
  0x31   : > { %1161 = vmatpush3.bf16.msra.mxu0 %v1257_v9  ;;  %1209 = vmatpush3.bf16.msra.mxu1 %v1257_v9 }
  0x34   : > { %1163 = vmatmul.mubr.bf16.vlgmr.msra.gmra.mrb[0].mxu0 %v1260_v10  ;;  %1179 = vmatmul.mubr.bf16.vlgmr.msra.gmra.mrb[0].mxu1 %v1261_v11 }
  0x35   : > { %1166 = vmatprep.mubr.bf16.mxu0 %v1262_v12  ;;  %1182 = vmatprep.mubr.bf16.mxu1 %v1263_v13 }
  0x3c   : > { %1167 = vmatmul.mubr.bf16.gmra.mrb[4].mxu0 %v1264_v14  ;;  %1183 = vmatmul.mubr.bf16.gmra.mrb[4].mxu1 %v1265_v15 }
  0x3d   : > { %1170 = vmatprep.mubr.bf16.mxu0 %v1266_v16  ;;  %1186 = vmatprep.mubr.bf16.mxu1 %v1267_v17 }
  0x44   : > { %1171 = vmatmul.mubr.bf16.gmra.mrb[8].mxu0 %v1268_v18  ;;  %1187 = vmatmul.mubr.bf16.gmra.mrb[8].mxu1 %v1269_v19 }
  0x45   : > { %1174 = vmatprep.mubr.bf16.mxu0 %v1270_v20  ;;  %1190 = vmatprep.mubr.bf16.mxu1 %v1271_v21 }
  0x4c   : > { %1175 = vmatmul.mubr.bf16.gmra.mrb[12].mxu0 %v1272_v22  ;;  %1191 = vmatmul.mubr.bf16.gmra.mrb[12].mxu1 %v1273_v23 }
 0x107   : > { %v1164_v25 = vpop.f32.mrb[0].mxu0  ;;  %v1180_v26 = vpop.f32.mrb[0].mxu1 }
 0x108   : > { %v845_v27 = vadd.f32 %v1164_v25, %v1408_v24  ;;  %v861_v28 = vadd.f32 %v1180_v26, %v1408_v24  ;;  %v610_v29 = vpop.f32.mrb[1].mxu0  ;;  %v674_v30 = vpop.f32.mrb[1].mxu1 }
 0x109   : > { %v843_v31 = vadd.f32 %v1408_v24, %v610_v29  ;;  %v859_v32 = vadd.f32 %v1408_v24, %v674_v30  ;;  %v1165_v33 = vpop.f32.mrb[2].mxu0  ;;  %v1181_v34 = vpop.f32.mrb[2].mxu1 }
 0x10a   : > { %v877_v35 = vmax.f32 %v845_v27, 0.0  ;;  %v893_v36 = vmax.f32 %v861_v28, 0.0  ;;  %v846_v37 = vadd.f32 %v1165_v33, %v1408_v24  ;;  %v862_v38 = vadd.f32 %v1181_v34, %v1408_v24  ;;  %v613_v39 = vpop.f32.mrb[3].mxu0  ;;  %v677_v40 = vpop.f32.mrb[3].mxu1 }
 0x10b   : > { %v875_v41 = vmax.f32 %v843_v31, 0.0  ;;  %v891_v42 = vmax.f32 %v859_v32, 0.0  ;;  %v844_v43 = vadd.f32 %v1408_v24, %v613_v39  ;;  %v860_v44 = vadd.f32 %v1408_v24, %v677_v40 }
 0x10c   : > { %909 = vst [vmem:[%s1416_s8 + $0x10] sm:$0xff] %v877_v35  ;;  %925 = vst [vmem:[%s1416_s8 + $0x90] sm:$0xff] %v893_v36  ;;  %v878_v45 = vmax.f32 %v846_v37, 0.0  ;;  %v894_v46 = vmax.f32 %v862_v38, 0.0 }
 0x10d   : > { %907 = vst [vmem:[%s1416_s8] sm:$0xff] %v875_v41  ;;  %923 = vst [vmem:[%s1416_s8 + $0x80] sm:$0xff] %v891_v42  ;;  %v876_v47 = vmax.f32 %v844_v43, 0.0  ;;  %v892_v48 = vmax.f32 %v860_v44, 0.0 }
 0x10e   : > { %910 = vst [vmem:[%s1416_s8 + $0x18] sm:$0xff] %v878_v45  ;;  %926 = vst [vmem:[%s1416_s8 + $0x98] sm:$0xff] %v894_v46 }
 0x10f   : > { %908 = vst [vmem:[%s1416_s8 + $0x8] sm:$0xff] %v876_v47  ;;  %924 = vst [vmem:[%s1416_s8 + $0x88] sm:$0xff] %v892_v48  ;;  %v1168_v49 = vpop.f32.mrb[4].mxu0  ;;  %v1184_v50 = vpop.f32.mrb[4].mxu1 }
 0x110   : > { %v849_v51 = vadd.f32 %v1168_v49, %v1408_v24  ;;  %v865_v52 = vadd.f32 %v1184_v50, %v1408_v24  ;;  %v626_v53 = vpop.f32.mrb[5].mxu0  ;;  %v690_v54 = vpop.f32.mrb[5].mxu1 }
 0x111   : > { %v847_v55 = vadd.f32 %v1408_v24, %v626_v53  ;;  %v863_v56 = vadd.f32 %v1408_v24, %v690_v54  ;;  %v1169_v57 = vpop.f32.mrb[6].mxu0  ;;  %v1185_v58 = vpop.f32.mrb[6].mxu1 }
 0x112   : > { %v881_v59 = vmax.f32 %v849_v51, 0.0  ;;  %v897_v60 = vmax.f32 %v865_v52, 0.0  ;;  %v850_v61 = vadd.f32 %v1169_v57, %v1408_v24  ;;  %v866_v62 = vadd.f32 %v1185_v58, %v1408_v24  ;;  %v629_v63 = vpop.f32.mrb[7].mxu0  ;;  %v693_v0 = vpop.f32.mrb[7].mxu1 }
 0x113   : > { %v879_v1 = vmax.f32 %v847_v55, 0.0  ;;  %v895_v2 = vmax.f32 %v863_v56, 0.0  ;;  %v848_v3 = vadd.f32 %v1408_v24, %v629_v63  ;;  %v864_v4 = vadd.f32 %v1408_v24, %v693_v0 }
 0x114   : > { %913 = vst [vmem:[%s1416_s8 + $0x30] sm:$0xff] %v881_v59  ;;  %929 = vst [vmem:[%s1416_s8 + $0xb0] sm:$0xff] %v897_v60  ;;  %v882_v5 = vmax.f32 %v850_v61, 0.0  ;;  %v898_v6 = vmax.f32 %v866_v62, 0.0 }
 0x115   : > { %911 = vst [vmem:[%s1416_s8 + $0x20] sm:$0xff] %v879_v1  ;;  %927 = vst [vmem:[%s1416_s8 + $0xa0] sm:$0xff] %v895_v2  ;;  %v880_v7 = vmax.f32 %v848_v3, 0.0  ;;  %v896_v8 = vmax.f32 %v864_v4, 0.0 }
 0x116   : > { %914 = vst [vmem:[%s1416_s8 + $0x38] sm:$0xff] %v882_v5  ;;  %930 = vst [vmem:[%s1416_s8 + $0xb8] sm:$0xff] %v898_v6 }
 0x117   : > { %912 = vst [vmem:[%s1416_s8 + $0x28] sm:$0xff] %v880_v7  ;;  %928 = vst [vmem:[%s1416_s8 + $0xa8] sm:$0xff] %v896_v8  ;;  %v1172_v9 = vpop.f32.mrb[8].mxu0  ;;  %v1188_v10 = vpop.f32.mrb[8].mxu1 }
 0x118   : > { %v853_v11 = vadd.f32 %v1172_v9, %v1408_v24  ;;  %v869_v12 = vadd.f32 %v1188_v10, %v1408_v24  ;;  %v642_v13 = vpop.f32.mrb[9].mxu0  ;;  %v706_v14 = vpop.f32.mrb[9].mxu1 }
 0x119   : > { %v851_v15 = vadd.f32 %v1408_v24, %v642_v13  ;;  %v867_v16 = vadd.f32 %v1408_v24, %v706_v14  ;;  %v1173_v17 = vpop.f32.mrb[10].mxu0  ;;  %v1189_v18 = vpop.f32.mrb[10].mxu1 }
 0x11a   : > { %v885_v19 = vmax.f32 %v853_v11, 0.0  ;;  %v901_v20 = vmax.f32 %v869_v12, 0.0  ;;  %v854_v21 = vadd.f32 %v1173_v17, %v1408_v24  ;;  %v870_v22 = vadd.f32 %v1189_v18, %v1408_v24  ;;  %v645_v23 = vpop.f32.mrb[11].mxu0  ;;  %v709_v25 = vpop.f32.mrb[11].mxu1 }
 0x11b   : > { %v883_v26 = vmax.f32 %v851_v15, 0.0  ;;  %v899_v27 = vmax.f32 %v867_v16, 0.0  ;;  %v852_v28 = vadd.f32 %v1408_v24, %v645_v23  ;;  %v868_v29 = vadd.f32 %v1408_v24, %v709_v25 }
 0x11c   : > { %917 = vst [vmem:[%s1416_s8 + $0x50] sm:$0xff] %v885_v19  ;;  %933 = vst [vmem:[%s1416_s8 + $0xd0] sm:$0xff] %v901_v20  ;;  %v886_v30 = vmax.f32 %v854_v21, 0.0  ;;  %v902_v31 = vmax.f32 %v870_v22, 0.0 }
 0x11d   : > { %915 = vst [vmem:[%s1416_s8 + $0x40] sm:$0xff] %v883_v26  ;;  %931 = vst [vmem:[%s1416_s8 + $0xc0] sm:$0xff] %v899_v27  ;;  %v884_v32 = vmax.f32 %v852_v28, 0.0  ;;  %v900_v33 = vmax.f32 %v868_v29, 0.0 }
 0x11e   : > { %918 = vst [vmem:[%s1416_s8 + $0x58] sm:$0xff] %v886_v30  ;;  %934 = vst [vmem:[%s1416_s8 + $0xd8] sm:$0xff] %v902_v31 }
 0x11f   : > { %916 = vst [vmem:[%s1416_s8 + $0x48] sm:$0xff] %v884_v32  ;;  %932 = vst [vmem:[%s1416_s8 + $0xc8] sm:$0xff] %v900_v33  ;;  %v1176_v34 = vpop.f32.mrb[12].mxu0  ;;  %v1192_v35 = vpop.f32.mrb[12].mxu1 }
 0x120   : > { %v857_v36 = vadd.f32 %v1176_v34, %v1408_v24  ;;  %v873_v37 = vadd.f32 %v1192_v35, %v1408_v24  ;;  %v658_v38 = vpop.f32.mrb[13].mxu0  ;;  %v722_v39 = vpop.f32.mrb[13].mxu1 }
 0x121   : > { %v855_v40 = vadd.f32 %v1408_v24, %v658_v38  ;;  %v871_v41 = vadd.f32 %v1408_v24, %v722_v39  ;;  %v1177_v42 = vpop.f32.mrb[14].mxu0  ;;  %v1193_v43 = vpop.f32.mrb[14].mxu1 }
 0x122   : > { %v889_v44 = vmax.f32 %v857_v36, 0.0  ;;  %v905_v45 = vmax.f32 %v873_v37, 0.0  ;;  %v858_v46 = vadd.f32 %v1177_v42, %v1408_v24  ;;  %v874_v47 = vadd.f32 %v1193_v43, %v1408_v24  ;;  %v661_v48 = vpop.f32.mrb[15].mxu0  ;;  %v725_v49 = vpop.f32.mrb[15].mxu1 }
 0x123   : > { %v887_v50 = vmax.f32 %v855_v40, 0.0  ;;  %v903_v51 = vmax.f32 %v871_v41, 0.0  ;;  %v856_v52 = vadd.f32 %v1408_v24, %v661_v48  ;;  %v872_v53 = vadd.f32 %v1408_v24, %v725_v49 }
 0x124   : > { %921 = vst [vmem:[%s1416_s8 + $0x70] sm:$0xff] %v889_v44  ;;  %937 = vst [vmem:[%s1416_s8 + $0xf0] sm:$0xff] %v905_v45  ;;  %v890_v54 = vmax.f32 %v858_v46, 0.0  ;;  %v906_v55 = vmax.f32 %v874_v47, 0.0 }
 0x125   : > { %919 = vst [vmem:[%s1416_s8 + $0x60] sm:$0xff] %v887_v50  ;;  %935 = vst [vmem:[%s1416_s8 + $0xe0] sm:$0xff] %v903_v51  ;;  %v888_v56 = vmax.f32 %v856_v52, 0.0  ;;  %v904_v57 = vmax.f32 %v872_v53, 0.0 }
 0x126   : > { %922 = vst [vmem:[%s1416_s8 + $0x78] sm:$0xff] %v890_v54  ;;  %938 = vst [vmem:[%s1416_s8 + $0xf8] sm:$0xff] %v906_v55 }
 0x127   : > { %920 = vst [vmem:[%s1416_s8 + $0x68] sm:$0xff] %v888_v56  ;;  %936 = vst [vmem:[%s1416_s8 + $0xe8] sm:$0xff] %v904_v57 }
 0x128 PF: > { %s13_s16 = sadd.s32 1, %s1312_s16   ;;  %s1499_s12 = smov %s1304_s14 }
 0x129   : > { %p10_p7 = scmp.ge.s32.totalorder %s13_s16, 10   ;;  %s1500_s13 = smov %s1308_s15 }
 0x12a   : > { %s1501_s14 = smov %s1504_s17  ;;  %s1502_s15 = smov %s1508_s18 }
 0x12b   :  { %12 = sbr.rel (!%p10_p7) target bundleno = 3 (0x3), region = 76 }

// kernel: multi_views_attention_forward.5
= control target key start
LH: loop header
LB: loop body
LE: loop exit
PB: predicated region body
PF: predicated region fallthrough
CT: control target
= control target key end

     0   :  { %s1166_s12 = smov 0   ;;  %s1168_s13 = smov 0   ;;  %s1286_s0 = inlined_call_operand.vmem [shape: bf16[4,128,256], index: 0, kind: input, shape index: {}]   ;;  %s1287_s1 = inlined_call_operand.vmem [shape: bf16[4,256,128], index: 1, kind: input, shape index: {}]   ;;  %s1288_s2 = inlined_call_operand.vmem [shape: f32[4,1,128], index: 2, kind: input, shape index: {}]   ;;  %s1289_s3 = inlined_call_operand.vmem [shape: f32[4,128,128], index: 3, kind: output, shape index: {}]  }
   0x1   :  { %s1170_s14 = smov 0  }
   0x2 LB: > { %s39_s15 = sadd.s32 1, %s1140_s13  ;;  %p933_p0 = scmp.ge.s32.totalorder %s1144_s14, 1  ;;  %s1144_s14 = sphi %s1170_s14, %s13_s14   ;;  %s1140_s13 = sphi %s1168_s13, %s1291_s13   ;;  %s1136_s12 = sphi %s1166_s12, %s1290_s12  }
   0x3   : > { %p41_p1 = scmp.ge.s32.totalorder %s39_s15, 4  ;;  %p217_p2 = scmp.lt.s32.totalorder %s1144_s14, 5 }
   0x5   : > { %s1293_s15 = smov (%p41_p1, %s39_s15), 0  ;;  %p218_p3 = pnand %p933_p0, %p217_p2 }
   0x6   : > { %p277_p4 = scmp.lt.s32.totalorder (!%p218_p3), %s1136_s12, 3 }
   0x7   : > { %221 = sbr.rel (%p218_p3) target bundleno = 296 (0x128), region = 32 }
   0xe   : > { %s1295_s12 = smov (!%p277_p4, %s1136_s12), 3 }
   0xf   : > { %s1187_s16 = sshll.u32 %s1295_s12, 7  ;;  %s309_s25 = scalar_lea.vmem %s1288_s2, %s1295_s12 }
  0x10   : > { %s1193_s19 = scalar_lea.vmem %s1287_s1, %s1187_s16  ;;  %s1208_s22 = scalar_lea.vmem %s1286_s0, %s1187_s16  ;;  %v1237_v35 = vld [vmem:[%s309_s25] ss:$0 sm:$0xff] }
  0x11   : > { %v1082_v0 = vld [vmem:[%s1193_s19 + $0x40] sm:$0xff]   ;;  %v1084_v2 = vld [vmem:[%s1193_s19 + $0x48] sm:$0xff]   ;;  %v1086_v4 = vld [vmem:[%s1193_s19 + $0x50] sm:$0xff]   ;;  %s1245_s28 = scalar_lea.vmem %s1289_s3, %s1187_s16 }
  0x12   : > { %v1083_v1 = vld [vmem:[%s1193_s19] sm:$0xff]   ;;  %978 = vmatprep.subr.bf16.mxu0 %v1082_v0  ;;  %1042 = vmatprep.subr.bf16.mxu1 %v1082_v0  ;;  %v1085_v3 = vld [vmem:[%s1193_s19 + $0x8] sm:$0xff]   ;;  %v1087_v5 = vld [vmem:[%s1193_s19 + $0x10] sm:$0xff]  }
  0x13   : > { %979 = vmatpush3.bf16.msra.mxu0 %v1083_v1  ;;  %1050 = vmatpush3.bf16.msra.mxu1 %v1083_v1  ;;  %v1088_v6 = vld [vmem:[%s1193_s19 + $0x58] sm:$0xff]   ;;  %v1090_v8 = vld [vmem:[%s1193_s19 + $0x60] sm:$0xff]   ;;  %v1092_v10 = vld [vmem:[%s1193_s19 + $0x68] sm:$0xff]  }
  0x14   : > { %980 = vmatprep.subr.bf16.mxu0 %v1084_v2  ;;  %1043 = vmatprep.subr.bf16.mxu1 %v1084_v2  ;;  %v1089_v7 = vld [vmem:[%s1193_s19 + $0x18] sm:$0xff]   ;;  %v1091_v9 = vld [vmem:[%s1193_s19 + $0x20] sm:$0xff]   ;;  %v1093_v13 = vld [vmem:[%s1193_s19 + $0x28] sm:$0xff]  }
  0x15   : > { %v1100_v11 = vld [vmem:[%s1208_s22 + $0x4] ss:$8 sps:$4 sm:$0xff]   ;;  %v1094_v14 = vld [vmem:[%s1193_s19 + $0x70] sm:$0xff]   ;;  %v1096_v16 = vld [vmem:[%s1193_s19 + $0x78] sm:$0xff]  }
  0x16   : > { %v1103_v12 = vld [vmem:[%s1208_s22 + $0x44] ss:$8 sps:$4 sm:$0xff]   ;;  %616 = vmatprep.mubr.bf16.mxu0 %v1100_v11  ;;  %v1095_v15 = vld [vmem:[%s1193_s19 + $0x30] sm:$0xff]   ;;  %v1097_v17 = vld [vmem:[%s1193_s19 + $0x38] sm:$0xff]  }
  0x17   : > { %981 = vmatpush3.bf16.msra.mxu0 %v1085_v3  ;;  %1051 = vmatpush3.bf16.msra.mxu1 %v1085_v3  ;;  %v1098_v18 = vld [vmem:[%s1208_s22] ss:$8 sps:$4 sm:$0xff]   ;;  %v1104_v20 = vld [vmem:[%s1208_s22 + $0x14] ss:$8 sps:$4 sm:$0xff]   ;;  %v1108_v22 = vld [vmem:[%s1208_s22 + $0x10] ss:$8 sps:$4 sm:$0xff]  }
  0x18   : > { %982 = vmatprep.subr.bf16.mxu0 %v1086_v4  ;;  %1044 = vmatprep.subr.bf16.mxu1 %v1086_v4  ;;  %v1101_v19 = vld [vmem:[%s1208_s22 + $0x40] ss:$8 sps:$4 sm:$0xff]   ;;  %v1106_v21 = vld [vmem:[%s1208_s22 + $0x54] ss:$8 sps:$4 sm:$0xff]   ;;  %v1109_v23 = vld [vmem:[%s1208_s22 + $0x50] ss:$8 sps:$4 sm:$0xff]  }
  0x19   : > { %648 = vmatprep.mubr.bf16.mxu1 %v1103_v12  ;;  %v1110_v24 = vld [vmem:[%s1208_s22 + $0x24] ss:$8 sps:$4 sm:$0xff]   ;;  %v1114_v26 = vld [vmem:[%s1208_s22 + $0x20] ss:$8 sps:$4 sm:$0xff]   ;;  %v1116_v28 = vld [vmem:[%s1208_s22 + $0x34] ss:$8 sps:$4 sm:$0xff]  }
  0x1a   : > { %v1112_v25 = vld [vmem:[%s1208_s22 + $0x64] ss:$8 sps:$4 sm:$0xff]   ;;  %v1115_v27 = vld [vmem:[%s1208_s22 + $0x60] ss:$8 sps:$4 sm:$0xff]   ;;  %v1118_v29 = vld [vmem:[%s1208_s22 + $0x74] ss:$8 sps:$4 sm:$0xff]  }
  0x1b   : > { %983 = vmatpush3.bf16.msra.mxu0 %v1087_v5  ;;  %1052 = vmatpush3.bf16.msra.mxu1 %v1087_v5  ;;  %v1120_v30 = vld [vmem:[%s1208_s22 + $0x30] ss:$8 sps:$4 sm:$0xff]  }
  0x1c   : > { %984 = vmatprep.subr.bf16.mxu0 %v1088_v6  ;;  %1045 = vmatprep.subr.bf16.mxu1 %v1088_v6  ;;  %v1121_v31 = vld [vmem:[%s1208_s22 + $0x70] ss:$8 sps:$4 sm:$0xff]  }
  0x1f   : > { %985 = vmatpush3.bf16.msra.mxu0 %v1089_v7  ;;  %1053 = vmatpush3.bf16.msra.mxu1 %v1089_v7 }
  0x20   : > { %986 = vmatprep.subr.bf16.mxu0 %v1090_v8  ;;  %1046 = vmatprep.subr.bf16.mxu1 %v1090_v8 }
  0x23   : > { %987 = vmatpush3.bf16.msra.mxu0 %v1091_v9  ;;  %1054 = vmatpush3.bf16.msra.mxu1 %v1091_v9 }
  0x24   : > { %988 = vmatprep.subr.bf16.mxu0 %v1092_v10  ;;  %1047 = vmatprep.subr.bf16.mxu1 %v1092_v10 }
  0x27   : > { %989 = vmatpush3.bf16.msra.mxu0 %v1093_v13  ;;  %1055 = vmatpush3.bf16.msra.mxu1 %v1093_v13 }
  0x28   : > { %990 = vmatprep.subr.bf16.mxu0 %v1094_v14  ;;  %1048 = vmatprep.subr.bf16.mxu1 %v1094_v14 }
  0x2b   : > { %991 = vmatpush3.bf16.msra.mxu0 %v1095_v15  ;;  %1056 = vmatpush3.bf16.msra.mxu1 %v1095_v15 }
  0x2c   : > { %992 = vmatprep.subr.bf16.mxu0 %v1096_v16  ;;  %1049 = vmatprep.subr.bf16.mxu1 %v1096_v16 }
  0x2f   : > { %993 = vmatpush3.bf16.msra.mxu0 %v1097_v17  ;;  %1057 = vmatpush3.bf16.msra.mxu1 %v1097_v17 }
  0x32   : > { %617 = vmatmul.mubr.bf16.vlgmr.msra.gmra.mrb[0].mxu0 %v1098_v18  ;;  %649 = vmatmul.mubr.bf16.vlgmr.msra.gmra.mrb[0].mxu1 %v1101_v19 }
  0x33   : > { %624 = vmatprep.mubr.bf16.mxu0 %v1104_v20  ;;  %656 = vmatprep.mubr.bf16.mxu1 %v1106_v21 }
  0x3a   : > { %625 = vmatmul.mubr.bf16.gmra.mrb[4].mxu0 %v1108_v22  ;;  %657 = vmatmul.mubr.bf16.gmra.mrb[4].mxu1 %v1109_v23 }
  0x3b   : > { %632 = vmatprep.mubr.bf16.mxu0 %v1110_v24  ;;  %664 = vmatprep.mubr.bf16.mxu1 %v1112_v25 }
  0x42   : > { %633 = vmatmul.mubr.bf16.gmra.mrb[8].mxu0 %v1114_v26  ;;  %665 = vmatmul.mubr.bf16.gmra.mrb[8].mxu1 %v1115_v27 }
  0x43   : > { %640 = vmatprep.mubr.bf16.mxu0 %v1116_v28  ;;  %672 = vmatprep.mubr.bf16.mxu1 %v1118_v29 }
  0x4a   : > { %641 = vmatmul.mubr.bf16.gmra.mrb[12].mxu0 %v1120_v30  ;;  %673 = vmatmul.mubr.bf16.gmra.mrb[12].mxu1 %v1121_v31 }
 0x105   : > { %v994_v32 = vpop.f32.mrb[0].mxu0  ;;  %v1018_v33 = vpop.f32.mrb[0].mxu1 }
 0x106   : > { %v995_v34 = vpop.f32.mrb[1].mxu0  ;;  %v1019_v36 = vpop.f32.mrb[1].mxu1 }
 0x107   : > { %v996_v37 = vadd.f32 %v995_v34, %v994_v32  ;;  %v1020_v38 = vadd.f32 %v1019_v36, %v1018_v33  ;;  %v997_v39 = vpop.f32.mrb[2].mxu0  ;;  %v1021_v40 = vpop.f32.mrb[2].mxu1 }
 0x108   : > { %v998_v41 = vpop.f32.mrb[3].mxu0  ;;  %v1022_v42 = vpop.f32.mrb[3].mxu1 }
 0x109   : > { %v739_v43 = vadd.f32 %v996_v37, %v1237_v35  ;;  %v747_v44 = vadd.f32 %v1020_v38, %v1237_v35  ;;  %v999_v45 = vadd.f32 %v998_v41, %v997_v39  ;;  %v1023_v46 = vadd.f32 %v1022_v42, %v1021_v40 }
 0x10b   : > { %v755_v47 = vmax.f32 %v739_v43, 0.0  ;;  %v763_v48 = vmax.f32 %v747_v44, 0.0  ;;  %v740_v49 = vadd.f32 %v999_v45, %v1237_v35  ;;  %v748_v50 = vadd.f32 %v1023_v46, %v1237_v35 }
 0x10d   : > { %771 = vst [vmem:[%s1245_s28] sm:$0xff] %v755_v47  ;;  %779 = vst [vmem:[%s1245_s28 + $0x40] sm:$0xff] %v763_v48  ;;  %v756_v51 = vmax.f32 %v740_v49, 0.0  ;;  %v764_v52 = vmax.f32 %v748_v50, 0.0  ;;  %v1000_v53 = vpop.f32.mrb[4].mxu0  ;;  %v1024_v54 = vpop.f32.mrb[4].mxu1 }
 0x10e   : > { %v1001_v55 = vpop.f32.mrb[5].mxu0  ;;  %v1025_v56 = vpop.f32.mrb[5].mxu1 }
 0x10f   : > { %772 = vst [vmem:[%s1245_s28 + $0x8] sm:$0xff] %v756_v51  ;;  %780 = vst [vmem:[%s1245_s28 + $0x48] sm:$0xff] %v764_v52  ;;  %v1002_v57 = vadd.f32 %v1001_v55, %v1000_v53  ;;  %v1026_v58 = vadd.f32 %v1025_v56, %v1024_v54  ;;  %v1003_v59 = vpop.f32.mrb[6].mxu0  ;;  %v1027_v60 = vpop.f32.mrb[6].mxu1 }
 0x110   : > { %v1004_v61 = vpop.f32.mrb[7].mxu0  ;;  %v1028_v62 = vpop.f32.mrb[7].mxu1 }
 0x111   : > { %v741_v63 = vadd.f32 %v1002_v57, %v1237_v35  ;;  %v749_v0 = vadd.f32 %v1026_v58, %v1237_v35  ;;  %v1005_v1 = vadd.f32 %v1004_v61, %v1003_v59  ;;  %v1029_v2 = vadd.f32 %v1028_v62, %v1027_v60 }
 0x113   : > { %v757_v3 = vmax.f32 %v741_v63, 0.0  ;;  %v765_v4 = vmax.f32 %v749_v0, 0.0  ;;  %v742_v5 = vadd.f32 %v1005_v1, %v1237_v35  ;;  %v750_v6 = vadd.f32 %v1029_v2, %v1237_v35 }
 0x115   : > { %773 = vst [vmem:[%s1245_s28 + $0x10] sm:$0xff] %v757_v3  ;;  %781 = vst [vmem:[%s1245_s28 + $0x50] sm:$0xff] %v765_v4  ;;  %v758_v7 = vmax.f32 %v742_v5, 0.0  ;;  %v766_v8 = vmax.f32 %v750_v6, 0.0  ;;  %v1006_v9 = vpop.f32.mrb[8].mxu0  ;;  %v1030_v10 = vpop.f32.mrb[8].mxu1 }
 0x116   : > { %v1007_v11 = vpop.f32.mrb[9].mxu0  ;;  %v1031_v12 = vpop.f32.mrb[9].mxu1 }
 0x117   : > { %774 = vst [vmem:[%s1245_s28 + $0x18] sm:$0xff] %v758_v7  ;;  %782 = vst [vmem:[%s1245_s28 + $0x58] sm:$0xff] %v766_v8  ;;  %v1008_v13 = vadd.f32 %v1007_v11, %v1006_v9  ;;  %v1032_v14 = vadd.f32 %v1031_v12, %v1030_v10  ;;  %v1009_v15 = vpop.f32.mrb[10].mxu0  ;;  %v1033_v16 = vpop.f32.mrb[10].mxu1 }
 0x118   : > { %v1010_v17 = vpop.f32.mrb[11].mxu0  ;;  %v1034_v18 = vpop.f32.mrb[11].mxu1 }
 0x119   : > { %v743_v19 = vadd.f32 %v1008_v13, %v1237_v35  ;;  %v751_v20 = vadd.f32 %v1032_v14, %v1237_v35  ;;  %v1011_v21 = vadd.f32 %v1010_v17, %v1009_v15  ;;  %v1035_v22 = vadd.f32 %v1034_v18, %v1033_v16 }
 0x11b   : > { %v759_v23 = vmax.f32 %v743_v19, 0.0  ;;  %v767_v24 = vmax.f32 %v751_v20, 0.0  ;;  %v744_v25 = vadd.f32 %v1011_v21, %v1237_v35  ;;  %v752_v26 = vadd.f32 %v1035_v22, %v1237_v35 }
 0x11d   : > { %775 = vst [vmem:[%s1245_s28 + $0x20] sm:$0xff] %v759_v23  ;;  %783 = vst [vmem:[%s1245_s28 + $0x60] sm:$0xff] %v767_v24  ;;  %v760_v27 = vmax.f32 %v744_v25, 0.0  ;;  %v768_v28 = vmax.f32 %v752_v26, 0.0  ;;  %v1012_v29 = vpop.f32.mrb[12].mxu0  ;;  %v1036_v30 = vpop.f32.mrb[12].mxu1 }
 0x11e   : > { %v1013_v31 = vpop.f32.mrb[13].mxu0  ;;  %v1037_v32 = vpop.f32.mrb[13].mxu1 }
 0x11f   : > { %776 = vst [vmem:[%s1245_s28 + $0x28] sm:$0xff] %v760_v27  ;;  %784 = vst [vmem:[%s1245_s28 + $0x68] sm:$0xff] %v768_v28  ;;  %v1014_v33 = vadd.f32 %v1013_v31, %v1012_v29  ;;  %v1038_v34 = vadd.f32 %v1037_v32, %v1036_v30  ;;  %v1015_v36 = vpop.f32.mrb[14].mxu0  ;;  %v1039_v37 = vpop.f32.mrb[14].mxu1 }
 0x120   : > { %v1016_v38 = vpop.f32.mrb[15].mxu0  ;;  %v1040_v39 = vpop.f32.mrb[15].mxu1 }
 0x121   : > { %v745_v40 = vadd.f32 %v1014_v33, %v1237_v35  ;;  %v753_v41 = vadd.f32 %v1038_v34, %v1237_v35  ;;  %v1017_v42 = vadd.f32 %v1016_v38, %v1015_v36  ;;  %v1041_v43 = vadd.f32 %v1040_v39, %v1039_v37 }
 0x123   : > { %v761_v44 = vmax.f32 %v745_v40, 0.0  ;;  %v769_v45 = vmax.f32 %v753_v41, 0.0  ;;  %v746_v46 = vadd.f32 %v1017_v42, %v1237_v35  ;;  %v754_v47 = vadd.f32 %v1041_v43, %v1237_v35 }
 0x125   : > { %777 = vst [vmem:[%s1245_s28 + $0x30] sm:$0xff] %v761_v44  ;;  %785 = vst [vmem:[%s1245_s28 + $0x70] sm:$0xff] %v769_v45  ;;  %v762_v48 = vmax.f32 %v746_v46, 0.0  ;;  %v770_v49 = vmax.f32 %v754_v47, 0.0 }
 0x127   : > { %778 = vst [vmem:[%s1245_s28 + $0x38] sm:$0xff] %v762_v48  ;;  %786 = vst [vmem:[%s1245_s28 + $0x78] sm:$0xff] %v770_v49 }
 0x128 PF: > { %s13_s14 = sadd.s32 1, %s1144_s14   ;;  %s1290_s12 = smov %s1140_s13 }
 0x129   : > { %p10_p5 = scmp.ge.s32.totalorder %s13_s14, 6   ;;  %s1291_s13 = smov %s1293_s15 }
 0x12b   :  { %12 = sbr.rel (!%p10_p5) target bundleno = 2 (0x2), region = 76 }

// kernel: multi_views_attention_forward.6
= control target key start
LH: loop header
LB: loop body
LE: loop exit
PB: predicated region body
PF: predicated region fallthrough
CT: control target
= control target key end

     0   :  { %s686_s12 = smov 0   ;;  %s688_s13 = smov 0   ;;  %s731_s0 = inlined_call_operand.vmem [shape: bf16[4,8,128], index: 0, kind: input, shape index: {}]   ;;  %s732_s1 = inlined_call_operand.vmem [shape: bf16[4,128,128], index: 1, kind: input, shape index: {}]   ;;  %s733_s2 = inlined_call_operand.vmem [shape: f32[4,1,128], index: 2, kind: input, shape index: {}]   ;;  %s734_s3 = inlined_call_operand.vmem [shape: f32[4,8,128], index: 3, kind: output, shape index: {}]  }
   0x1   :  { %s690_s14 = smov 0  }
   0x2 LB: > { %s39_s15 = sadd.s32 1, %s658_s13  ;;  %p560_p0 = scmp.ge.s32.totalorder %s662_s14, 1  ;;  %s662_s14 = sphi %s690_s14, %s13_s14   ;;  %s658_s13 = sphi %s688_s13, %s736_s13   ;;  %s654_s12 = sphi %s686_s12, %s735_s12  }
   0x3   : > { %p41_p1 = scmp.ge.s32.totalorder %s39_s15, 4  ;;  %p211_p2 = scmp.lt.s32.totalorder %s662_s14, 5 }
   0x5   : > { %s738_s15 = smov (%p41_p1, %s39_s15), 0  ;;  %p212_p3 = pnand %p560_p0, %p211_p2 }
   0x6   : > { %p263_p4 = scmp.lt.s32.totalorder (!%p212_p3), %s654_s12, 3  ;;  %v664_v0 = vmov (!%p212_p3), 0.0   ;;  %vm665_vm0 = vmmov (!%p212_p3), 0  }
   0x7   : > { %215 = sbr.rel (%p212_p3) target bundleno = 266 (0x10a), region = 32  ;;  %586 = vmatprep.subr.bf16.mxu0 (!%p212_p3), %v664_v0  ;;  %602 = vmatprep.mubr.msk.bf16.mxu0 (!%p212_p3), %vm665_vm0, %v664_v0 }
   0xe   : > { %s740_s12 = smov (!%p263_p4, %s654_s12), 3 }
   0xf   : > { %s576_s16 = sshll.u32 %s740_s12, 6  ;;  %s561_s20 = sshll.u32 %s740_s12, 2 }
  0x10   : > { %s284_s19 = scalar_lea.vmem %s732_s1, %s576_s16  ;;  %s272_s23 = scalar_lea.vmem %s731_s0, %s561_s20 }
  0x11   : > { %v632_v1 = vld [vmem:[%s284_s19] sm:$0xff]   ;;  %v633_v2 = vld [vmem:[%s284_s19 + $0x8] sm:$0xff]   ;;  %v634_v3 = vld [vmem:[%s284_s19 + $0x10] sm:$0xff]   ;;  %s291_s26 = scalar_lea.vmem %s733_s2, %s740_s12  ;;  %s564_s27 = sshll.u32 %s740_s12, 3 }
  0x12   : > { %587 = vmatpush3.bf16.msra.mxu0 %v632_v1  ;;  %v635_v4 = vld [vmem:[%s284_s19 + $0x18] sm:$0xff]   ;;  %v636_v5 = vld [vmem:[%s284_s19 + $0x20] sm:$0xff]   ;;  %v637_v6 = vld [vmem:[%s284_s19 + $0x28] sm:$0xff]   ;;  %s301_s30 = scalar_lea.vmem %s734_s3, %s564_s27 }
  0x13   : > { %588 = vmatprep.subr.bf16.mxu0 %v664_v0  ;;  %v638_v7 = vld [vmem:[%s284_s19 + $0x30] sm:$0xff]   ;;  %v639_v8 = vld [vmem:[%s284_s19 + $0x38] sm:$0xff]   ;;  %v309_v9 = vld [vmem:[%s272_s23] sm:$0xf] }
  0x14   : > { %v573_v10 = vld [vmem:[%s291_s26] ss:$0 sm:$0xff] }
  0x16   : > { %589 = vmatpush3.bf16.msra.mxu0 %v633_v2 }
  0x17   : > { %590 = vmatprep.subr.bf16.mxu0 %v664_v0 }
  0x1a   : > { %591 = vmatpush3.bf16.msra.mxu0 %v634_v3 }
  0x1b   : > { %592 = vmatprep.subr.bf16.mxu0 %v664_v0 }
  0x1e   : > { %593 = vmatpush3.bf16.msra.mxu0 %v635_v4 }
  0x1f   : > { %594 = vmatprep.subr.bf16.mxu0 %v664_v0 }
  0x22   : > { %595 = vmatpush3.bf16.msra.mxu0 %v636_v5 }
  0x23   : > { %596 = vmatprep.subr.bf16.mxu0 %v664_v0 }
  0x26   : > { %597 = vmatpush3.bf16.msra.mxu0 %v637_v6 }
  0x27   : > { %598 = vmatprep.subr.bf16.mxu0 %v664_v0 }
  0x2a   : > { %599 = vmatpush3.bf16.msra.mxu0 %v638_v7 }
  0x2b   : > { %600 = vmatprep.subr.bf16.mxu0 %v664_v0 }
  0x2e   : > { %601 = vmatpush3.bf16.msra.mxu0 %v639_v8 }
  0x31   : > { %603 = vmatmul.mubr.bf16.vlgmr.msra.gmra.mrb[0].mxu0 %v309_v9 }
 0x104   : > { %v408_v11 = vpop.f32.mrb[0].mxu0 }
 0x105   : > { %v427_v12 = vadd.f32 %v573_v10, %v408_v11  ;;  %v604_v13 = vpop.f32.mrb[1].mxu0 }
 0x106   : > { %v411_v14 = vpop.f32.mrb[2].mxu0 }
 0x107   : > { %v428_v15 = vmax.f32 %v427_v12, 0.0  ;;  %v605_v16 = vpop.f32.mrb[3].mxu0 }
 0x109   : > { %429 = vst [vmem:[%s301_s30] sm:$0xff] %v428_v15 }
 0x10a PF: > { %s13_s14 = sadd.s32 1, %s662_s14   ;;  %s735_s12 = smov %s658_s13 }
 0x10b   : > { %p10_p5 = scmp.ge.s32.totalorder %s13_s14, 6   ;;  %s736_s13 = smov %s738_s15 }
 0x10d   :  { %12 = sbr.rel (!%p10_p5) target bundleno = 2 (0x2), region = 76 }

// kernel: multi_views_attention_forward.7
= control target key start
LH: loop header
LB: loop body
LE: loop exit
PB: predicated region body
PF: predicated region fallthrough
CT: control target
= control target key end

     0   :  { %v411_v3 = vmov 0.0|0.0   ;;  %vm412_vm0 = vmmov 0   ;;  %v413_v6 = vmov 0.0   ;;  %s495_s0 = inlined_call_operand.vmem [shape: f32[8,32], index: 0, kind: input, shape index: {}]   ;;  %s496_s1 = inlined_call_operand.vmem [shape: f32[32,16], index: 1, kind: input, shape index: {}]   ;;  %s497_s2 = inlined_call_operand.vmem [shape: f32[32,16], index: 2, kind: input, shape index: {}]   ;;  %s498_s3 = inlined_call_operand.vmem [shape: f32[1,16], index: 3, kind: input, shape index: {}]   ;;  %s499_s4 = inlined_call_operand.hbm [shape: f32[2,32], index: 4, kind: output, shape index: {}]  }
   0x1   :  { %v98_v0 = vld [vmem:[%s497_s2] sm:$0xff]  ;;  %v99_v1 = vld [vmem:[%s497_s2 + $0x8] sm:$0xff]  ;;  %v100_v2 = vld [vmem:[%s497_s2 + $0x10] sm:$0xff]  ;;  %355 = vmatprep.subr.bf16.mxu1 %v411_v3  ;;  %346 = vmatprep.mubr.msk.f32.mxu1 %vm412_vm0, %v413_v6 }
   0x2   :  { %v356_v4 = vpack.c.bf16 %v99_v1, %v98_v0  ;;  %v101_v5 = vld [vmem:[%s497_s2 + $0x18] sm:$0xff]  ;;  %v19_v7 = vld [vmem:[%s496_s1] sm:$0xff]  ;;  %349 = vmatprep.subr.bf16.mxu0 %v411_v3  ;;  %v20_v8 = vld [vmem:[%s496_s1 + $0x8] sm:$0xff]  ;;  %335 = vmatprep.mubr.msk.f32.mxu0 %vm412_vm0, %v413_v6 }
   0x3   :  { %v21_v9 = vld [vmem:[%s496_s1 + $0x10] sm:$0xff]  ;;  %v22_v10 = vld [vmem:[%s496_s1 + $0x18] sm:$0xff]  ;;  %v359_v11 = vpack.c.bf16 %v101_v5, %v100_v2  ;;  %v350_v12 = vpack.c.bf16 %v20_v8, %v19_v7 }
   0x4   :  { %357 = vmatpush3.bf16.msra.mxu1 %v356_v4 }
   0x5   :  { %9 = vsyncpa [#allocation3], 0  ;;  %358 = vmatprep.subr.bf16.mxu1 %v411_v3  ;;  %351 = vmatpush3.bf16.msra.mxu0 %v350_v12  ;;  %v353_v13 = vpack.c.bf16 %v22_v10, %v21_v9  ;;  %v467_v14 = vld [vmem:[%s495_s0] sm:$0xff]  ;;  %vm23_vm1 = vcmask 261120   ;;  %vm187_vm2 = vcmask 130048   ;;  %vm191_vm3 = vcmask 1041408  }
   0x6   :  { %352 = vmatprep.subr.bf16.mxu0 %v411_v3  ;;  %v316_v24 = vld [vmem:[%s498_s3] ss:$0 sm:$0xff]  ;;  %vm213_vm4 = vcmask 1043458   ;;  %vm241_vm5 = vcmask 1045508   ;;  %vm269_vm6 = vcmask 1047558   ;;  %s414_s3 = smov [#allocation2]  }
   0x7   :  { %s305_s6 = sshll.u32 %s414_s3, 4  ;;  %vm297_vm7 = vcmask 254976   ;;  %s306_s6 = int_to_ptr.vmem [resolvable:$true] %s305_s6 }
   0x8   :  { %360 = vmatpush3.bf16.msra.mxu1 %v359_v11  ;;  %s387_s7 = scalar_lea.vmem %s306_s6, 32  ;;  %p392_p1 = scmp.lt.s32.totalorder %s306_s6, %s306_s6 }
   0x9   :  { %354 = vmatpush3.bf16.msra.mxu0 %v353_v13  ;;  %p388_p0 = scmp.ne.s32.totalorder %s306_s6, %s387_s7  ;;  %p393_p2 = scmp.lt.s32.totalorder %s387_s7, %s387_s7 }
   0xb   :  { %347 = vmatmul.mubr.msk.f32.vlgmr.msra.gmra.mrb[0].mxu1 %vm23_vm1, %v467_v14  ;;  %p394_p3 = por %p393_p2, %p392_p1 }
   0xc   :  { %336 = vmatmul.mubr.msk.f32.vlgmr.msra.gmra.mrb[0].mxu0 %vm23_vm1, %v467_v14 }
   0xd   :  { %p395_p4 = pnand %p394_p3, %p388_p0 }
  0xde   :  { %v168_v15 = vpop.f32.mrb[0].mxu1 }
  0xdf   :  { %v315_v16 = vmul.f32 -1.442695, %v168_v15  ;;  %v348_v17 = vpop.f32.mrb[1].mxu1  ;;  %v93_v18 = vpop.f32.mrb[0].mxu0 }
  0xe0   :  { %v337_v19 = vpop.f32.mrb[1].mxu0 }
  0xe1   :  { %365 = vpow2.f32 %v315_v16 }
  0xe2   :  { %367 = vtanh.f32 %v93_v18 }
  0xeb   :  { %v366_v20 = vpop.eup %365 }
  0xec   :  { %v175_v21 = vadd.f32 1.0, %v366_v20  ;;  %v368_v22 = vpop.eup %367 }
  0xee   :  { %369 = vrcp.f32 %v175_v21 }
  0xf8   :  { %v370_v23 = vpop.eup %369 }
  0xf9   :  { %v178_v25 = vmul.f32 %v370_v23, %v368_v22 }
  0xfb   :  { %v186_v26 = vmul.f32 %v316_v24, %v178_v25 }
  0xfd   :  { %v188_v27 = vsel %vm187_vm2, %v186_v26, 0.0 }
  0xfe   :  { %189 = vadd.xlane.f32.xlu0 %v188_v27 }
 0x18b   :  { %v190_v28 = vpop.xlane.xlu0 %189 }
 0x18c   :  { %v192_v29 = vsel %vm191_vm3, %v190_v28, -inf  ;;  %v214_v30 = vsel %vm213_vm4, %v190_v28, -inf  ;;  %v242_v31 = vsel %vm241_vm5, %v190_v28, -inf  ;;  %v270_v32 = vsel %vm269_vm6, %v190_v28, -inf }
 0x18d   :  { %v193_v33 = vrot.slane %v192_v29, 4  ;;  %v215_v34 = vrot.slane %v214_v30, 4  ;;  %v243_v35 = vrot.slane %v242_v31, 4  ;;  %v271_v36 = vrot.slane %v270_v32, 4 }
 0x18f   :  { %v194_v37 = vmax.f32 %v192_v29, %v193_v33  ;;  %v216_v38 = vmax.f32 %v214_v30, %v215_v34  ;;  %v244_v39 = vmax.f32 %v242_v31, %v243_v35  ;;  %v272_v40 = vmax.f32 %v270_v32, %v271_v36 }
 0x191   :  { %v195_v41 = vrot.slane %v194_v37, 2  ;;  %v217_v42 = vrot.slane %v216_v38, 2  ;;  %v245_v43 = vrot.slane %v244_v39, 2  ;;  %v273_v44 = vrot.slane %v272_v40, 2 }
 0x193   :  { %v196_v45 = vmax.f32 %v194_v37, %v195_v41  ;;  %v218_v46 = vmax.f32 %v216_v38, %v217_v42  ;;  %v246_v47 = vmax.f32 %v244_v39, %v245_v43  ;;  %v274_v48 = vmax.f32 %v272_v40, %v273_v44 }
 0x195   :  { %v197_v49 = vrot.slane %v196_v45, 1  ;;  %v219_v50 = vrot.slane %v218_v46, 1  ;;  %v247_v51 = vrot.slane %v246_v47, 1  ;;  %v275_v52 = vrot.slane %v274_v48, 1 }
 0x197   :  { %v198_v53 = vmax.f32 %v196_v45, %v197_v49  ;;  %v220_v54 = vmax.f32 %v218_v46, %v219_v50  ;;  %v248_v55 = vmax.f32 %v246_v47, %v247_v51  ;;  %v276_v56 = vmax.f32 %v274_v48, %v275_v52 }
 0x199   :  { %v199_v57 = vsub.f32 %v190_v28, %v198_v53  ;;  %v221_v58 = vsub.f32 %v190_v28, %v220_v54  ;;  %v249_v59 = vsub.f32 %v190_v28, %v248_v55  ;;  %v277_v60 = vsub.f32 %v190_v28, %v276_v56 }
 0x19b   :  { %v200_v61 = vmul.f32 1.442695, %v199_v57  ;;  %v222_v62 = vmul.f32 1.442695, %v221_v58  ;;  %v250_v63 = vmul.f32 1.442695, %v249_v59 }
 0x19c   :  { %v278_v0 = vmul.f32 1.442695, %v277_v60 }
 0x19d   :  { %371 = vpow2.f32 %v200_v61 }
 0x19e   :  { %373 = vpow2.f32 %v222_v62 }
 0x19f   :  { %375 = vpow2.f32 %v250_v63 }
 0x1a0   :  { %377 = vpow2.f32 %v278_v0 }
 0x1a7   :  { %v372_v1 = vpop.eup %371 }
 0x1a8   :  { %v374_v2 = vpop.eup %373  ;;  %v202_v3 = vsel %vm191_vm3, %v372_v1, 0.0 }
 0x1a9   :  { %v376_v4 = vpop.eup %375  ;;  %v203_v5 = vrot.slane %v202_v3, 4  ;;  %v225_v6 = vrot.slane %v374_v2, 2 }
 0x1aa   :  { %v378_v7 = vpop.eup %377  ;;  %v253_v8 = vrot.slane %v376_v4, 4 }
 0x1ab   :  { %v227_v9 = vsel %vm191_vm3, %v225_v6, 0.0  ;;  %v204_v10 = vadd.f32 %v203_v5, %v202_v3  ;;  %v281_v11 = vrot.slane %v378_v7, 6 }
 0x1ac   :  { %v228_v12 = vrot.slane %v227_v9, 4  ;;  %v255_v13 = vsel %vm191_vm3, %v253_v8, 0.0 }
 0x1ad   :  { %v205_v15 = vrot.slane %v204_v10, 2  ;;  %v256_v16 = vrot.slane %v255_v13, 4  ;;  %v283_v17 = vsel %vm191_vm3, %v281_v11, 0.0 }
 0x1ae   :  { %v229_v18 = vadd.f32 %v228_v12, %v227_v9  ;;  %v284_v19 = vrot.slane %v283_v17, 4 }
 0x1af   :  { %v206_v20 = vadd.f32 %v205_v15, %v204_v10  ;;  %v257_v21 = vadd.f32 %v256_v16, %v255_v13 }
 0x1b0   :  { %v230_v22 = vrot.slane %v229_v18, 2  ;;  %v285_v23 = vadd.f32 %v284_v19, %v283_v17 }
 0x1b1   :  { %v207_v24 = vrot.slane %v206_v20, 1  ;;  %v258_v25 = vrot.slane %v257_v21, 2 }
 0x1b2   :  { %v231_v26 = vadd.f32 %v230_v22, %v229_v18  ;;  %v286_v27 = vrot.slane %v285_v23, 2 }
 0x1b3   :  { %v208_v28 = vadd.f32 %v207_v24, %v206_v20  ;;  %v259_v29 = vadd.f32 %v258_v25, %v257_v21 }
 0x1b4   :  { %v232_v30 = vrot.slane %v231_v26, 1  ;;  %v287_v31 = vadd.f32 %v286_v27, %v285_v23 }
 0x1b5   :  { %v260_v32 = vrot.slane %v259_v29, 1  ;;  %379 = vrcp.f32 %v208_v28 }
 0x1b6   :  { %v233_v33 = vadd.f32 %v232_v30, %v231_v26  ;;  %v288_v34 = vrot.slane %v287_v31, 1 }
 0x1b7   :  { %v261_v35 = vadd.f32 %v260_v32, %v259_v29 }
 0x1b8   :  { %381 = vrcp.f32 %v233_v33  ;;  %v289_v36 = vadd.f32 %v288_v34, %v287_v31 }
 0x1b9   :  { %383 = vrcp.f32 %v261_v35 }
 0x1ba   :  { %385 = vrcp.f32 %v289_v36 }
 0x1bf   :  { %v380_v37 = vpop.eup %379 }
 0x1c0   :  { %v210_v40 = vmul.f32 %v380_v37, %v372_v1 }
 0x1c2   :  { %v382_v38 = vpop.eup %381  ;;  %v211_v47 = vmul.f32 %v210_v40, %v467_v14 }
 0x1c3   :  { %v384_v39 = vpop.eup %383  ;;  %v235_v41 = vmul.f32 %v382_v38, %v374_v2 }
 0x1c4   :  { %v386_v42 = vpop.eup %385  ;;  %v263_v43 = vmul.f32 %v384_v39, %v376_v4 }
 0x1c5   :  { %v236_v44 = vmul.f32 %v235_v41, %v467_v14  ;;  %v291_v45 = vmul.f32 %v386_v42, %v378_v7 }
 0x1c6   :  { %v264_v46 = vmul.f32 %v263_v43, %v467_v14 }
 0x1c7   :  { %v238_v48 = vrot.slane %v236_v44, 2  ;;  %v292_v49 = vmul.f32 %v291_v45, %v467_v14 }
 0x1c8   :  { %v266_v51 = vrot.slane %v264_v46, 4 }
 0x1c9   :  { %v240_v50 = vadd.f32 %v238_v48, %v211_v47  ;;  %v294_v53 = vrot.slane %v292_v49, 6 }
 0x1cb   :  { %v268_v52 = vadd.f32 %v266_v51, %v240_v50 }
 0x1cd   :  { %v296_v54 = vadd.f32 %v294_v53, %v268_v52 }
 0x1cf   :  { %298 = vst.msk [vmem:[#allocation2] sm:$0x3] %vm297_vm7, %v296_v54 }
 0x1d0   :  { %398 = shalt.err (!%p395_p4)
}
 0x1d1   :  { %s399_s10 = scalar_lea.hbm %s499_s4, 32 }
 0x1d2   :  { %p400_p5 = scmp.ne.s32.totalorder %s499_s4, %s399_s10  ;;  %p403_p6 = scmp.lt.u32.totalorder %s399_s10, %s499_s4 }
 0x1d4   :  { %p405_p7 = pnand %p403_p6, %p400_p5 }
 0x1d6   :  { %408 = shalt.err (!%p405_p7)
}
 0x1d7   :  { %308 = dma.vmem_to_hbm [thread:$0]  %s306_s6, 32, %s499_s4, [#allocation3]  }
 0x1d8   :  { %409 = dma.done.wait [#allocation3], 32  }
 0x1d9   :  { %410 = vsyncadd [#allocation3], 4294967264 }
 0x1da   :  { %312 = vsyncpa [#allocation3], 1 }

</bundles_post_ra>
